<compile_context>
chip_gen: v7x
topology: tpu7x:2x2x1
jax: 0.10.0
libtpu: 0.0.40
codegen_flags: <defaults>
</compile_context>

<pallas_src>
import math

import jax
import jax.numpy as jnp
from jax.experimental import pallas as pl
from jax.experimental.pallas import tpu as pltpu

EPS = 1e-6                     # LayerNorm eps (partial(nn.LayerNorm, eps=1e-06))
_SQRT_2_OVER_PI = 0.7978845608028654


# ----------------------------- in-kernel helpers -----------------------------

def _layernorm(x, g, b):
    mu = jnp.mean(x, axis=-1, keepdims=True)
    xc = x - mu
    var = jnp.mean(xc * xc, axis=-1, keepdims=True)
    return xc * jax.lax.rsqrt(var + EPS) * g + b


def _gelu_tanh(x):
    # tanh-approximate GELU: the tanh rides the EUP slot and overlaps MXU work.
    return 0.5 * x * (1.0 + jnp.tanh(_SQRT_2_OVER_PI * (x + 0.044715 * x * x * x)))


# --------------------------------- kernel ------------------------------------

def make_encoder_kernel(num_heads, num_layers):
    """Whole-encoder kernel, one grid step per (batch element, layer)."""

    def kernel(x_ref, pos_ref, pd_ref, wqkv_ref, bqkv_ref, wo_ref,
               w1_ref, b1_ref, w2_ref, o_ref, res_ref):
        l = pl.program_id(1)
        S, D = res_ref.shape
        H = num_heads
        Dh = D // H

        # Residual stream lives in VMEM scratch across the layer axis; read the
        # HBM input (and add pos-embedding) only at the first layer.
        @pl.when(l == 0)
        def _():
            res_ref[...] = x_ref[0] + pos_ref[0]

        x = res_ref[...]                          # (S, D) f32 residual stream

        pd = pd_ref[0]                            # (8, D) packed small params
        ln1_g, ln1_b = pd[0:1], pd[1:2]
        ln2_g, ln2_b = pd[2:3], pd[3:4]
        bo, b2 = pd[4:5], pd[5:6]

        # --- ln_1 + fused QKV projection: single lane-dense (S,D)@(D,3D) ---
        xn = _layernorm(x, ln1_g, ln1_b).astype(jnp.bfloat16)
        qkv = (jnp.dot(xn, wqkv_ref[0], preferred_element_type=jnp.float32)
               + bqkv_ref[0]).astype(jnp.bfloat16)                     # (S, 3D)

        # --- per-head attention core (K=Dh matmuls are inherent to MHA) ---
        ctx_parts = []
        for h in range(H):                        # static unroll over heads
            qh = qkv[:, h * Dh:(h + 1) * Dh]                           # (S, Dh)
            kh = qkv[:, D + h * Dh:D + (h + 1) * Dh]
            vh = qkv[:, 2 * D + h * Dh:2 * D + (h + 1) * Dh]
            s = jnp.einsum('qd,kd->qk', qh, kh,
                           preferred_element_type=jnp.float32)         # (S, S)
            s = s - jnp.max(s, axis=-1, keepdims=True)
            p = jnp.exp(s)
            p = p * pl.reciprocal(jnp.sum(p, axis=-1, keepdims=True), approx=True)
            ctx_parts.append(
                jnp.dot(p.astype(jnp.bfloat16), vh,
                        preferred_element_type=jnp.float32).astype(jnp.bfloat16))
        ctx = jnp.concatenate(ctx_parts, axis=-1)                      # (S, D) bf16

        # --- single full-depth out-projection (S,D)@(D,D) ---
        attn = jnp.dot(ctx, wo_ref[0], preferred_element_type=jnp.float32) + bo
        x1 = x + attn                             # residual 1 (dropout = identity)

        # --- ln_2 + MLP (Linear -> GELU -> Linear) ---
        yn = _layernorm(x1, ln2_g, ln2_b).astype(jnp.bfloat16)
        h1 = _gelu_tanh(jnp.dot(yn, w1_ref[0],
                                preferred_element_type=jnp.float32) + b1_ref[0])
        y2 = jnp.dot(h1.astype(jnp.bfloat16), w2_ref[0],
                     preferred_element_type=jnp.float32) + b2

        out = x1 + y2                             # residual 2
        res_ref[...] = out                        # carry to the next layer

        # Final encoder LayerNorm fused into the last layer; only then is the
        # output block actually written (it is copied back to HBM when the
        # batch block index advances).
        @pl.when(l == num_layers - 1)
        def _():
            o_ref[0] = _layernorm(out, pd[6:7], pd[7:8])

    return kernel


# --------------------------------- wrappers ----------------------------------

def _vmem_limit_bytes():
    # Budget ~3/4 of physical VMEM: ~48 MiB on v7x (64 MiB/core),
    # ~96 MiB on v5e/v6e (128 MiB).  Never hard-code the full capacity.
    try:
        cap = int(pltpu.get_tpu_info().vmem_capacity_bytes)
    except Exception:
        cap = 128 * 1024 * 1024
    return min((cap * 3) // 4, 100 * 1024 * 1024)


def encoder_forward(x, params, num_heads):
    B, S, D = x.shape
    L = params["pd"].shape[0]
    M = params["w1"].shape[-1]

    in_specs = [
        pl.BlockSpec((1, S, D), lambda b, l: (b, 0, 0)),      # x (fetched once per b)
        pl.BlockSpec((1, S, D), lambda b, l: (0, 0, 0)),      # pos embedding
        pl.BlockSpec((1, 8, D), lambda b, l: (l, 0, 0)),      # packed small params
        pl.BlockSpec((1, D, 3 * D), lambda b, l: (l, 0, 0)),  # fused qkv weight
        pl.BlockSpec((1, 1, 3 * D), lambda b, l: (l, 0, 0)),  # fused qkv bias
        pl.BlockSpec((1, D, D), lambda b, l: (l, 0, 0)),      # out-proj weight
        pl.BlockSpec((1, D, M), lambda b, l: (l, 0, 0)),      # mlp w1
        pl.BlockSpec((1, 1, M), lambda b, l: (l, 0, 0)),      # mlp b1
        pl.BlockSpec((1, M, D), lambda b, l: (l, 0, 0)),      # mlp w2
    ]
    out_specs = pl.BlockSpec((1, S, D), lambda b, l: (b, 0, 0))

    return pl.pallas_call(
        make_encoder_kernel(num_heads, L),
        out_shape=jax.ShapeDtypeStruct((B, S, D), jnp.float32),
        grid=(B, L),
        in_specs=in_specs,
        out_specs=out_specs,
        scratch_shapes=[pltpu.VMEM((S, D), jnp.float32)],     # residual stream
        compiler_params=pltpu.CompilerParams(
            dimension_semantics=("parallel", "arbitrary"),
            vmem_limit_bytes=_vmem_limit_bytes(),
        ),
    )(x, params["pos"], params["pd"], params["wqkv"], params["bqkv"],
      params["wo"], params["w1"], params["b1"], params["w2"])


# ------------------------- parameter init / packing ---------------------------

def init_raw_params(key, seq_length, num_layers, hidden_dim, mlp_dim):
    """Torch-layout parameters (weights are (out_features, in_features))."""
    D, M = hidden_dim, mlp_dim
    keys = jax.random.split(key, 1 + num_layers)
    pos = 0.02 * jax.random.normal(keys[0], (1, seq_length, D), jnp.float32)

    def xavier(k, shape):
        a = math.sqrt(6.0 / (shape[0] + shape[1]))
        return jax.random.uniform(k, shape, jnp.float32, -a, a)

    layers = []
    for i in range(num_layers):
        ks = jax.random.split(keys[1 + i], 6)
        layers.append(dict(
            ln1_g=jnp.ones((D,), jnp.float32), ln1_b=jnp.zeros((D,), jnp.float32),
            in_proj_w=xavier(ks[0], (3 * D, D)),             # MHA in_proj_weight
            in_proj_b=jnp.zeros((3 * D,), jnp.float32),      # torch init: zeros
            out_proj_w=xavier(ks[1], (D, D)),
            out_proj_b=jnp.zeros((D,), jnp.float32),
            ln2_g=jnp.ones((D,), jnp.float32), ln2_b=jnp.zeros((D,), jnp.float32),
            w1=xavier(ks[2], (M, D)),
            b1=1e-6 * jax.random.normal(ks[4], (M,), jnp.float32),
            w2=xavier(ks[3], (D, M)),
            b2=1e-6 * jax.random.normal(ks[5], (D,), jnp.float32),
        ))
    return dict(pos=pos, layers=layers,
                ln_g=jnp.ones((D,), jnp.float32), ln_b=jnp.zeros((D,), jnp.float32))


def pack_params(raw, num_heads):
    """Stack per-layer weights along a leading L dim, bf16 matmul weights,
    f32 biases/LN params, q-scale folded into the fused qkv weight/bias."""
    layers = raw["layers"]
    L = len(layers)
    D = raw["pos"].shape[-1]
    assert D % num_heads == 0
    Dh = D // num_heads
    scale = 1.0 / math.sqrt(Dh)
    qscale = jnp.concatenate([jnp.full((D,), scale, jnp.float32),
                              jnp.ones((2 * D,), jnp.float32)])

    pd, wqkv, bqkv, wo, w1, b1, w2 = [], [], [], [], [], [], []
    for i, Lr in enumerate(layers):
        last = (i == L - 1)
        lnf_g = raw["ln_g"] if last else jnp.ones((D,), jnp.float32)
        lnf_b = raw["ln_b"] if last else jnp.zeros((D,), jnp.float32)
        wqkv.append((Lr["in_proj_w"] * qscale[:, None]).T.astype(jnp.bfloat16))  # (D,3D)
        bqkv.append((Lr["in_proj_b"] * qscale).reshape(1, 3 * D).astype(jnp.float32))
        wo.append(Lr["out_proj_w"].T.astype(jnp.bfloat16))                        # (D,D)
        w1.append(Lr["w1"].T.astype(jnp.bfloat16))                                # (D,M)
        b1.append(Lr["b1"].reshape(1, -1).astype(jnp.float32))                    # (1,M)
        w2.append(Lr["w2"].T.astype(jnp.bfloat16))                                # (M,D)
        # packed small f32 params: ln1_g, ln1_b, ln2_g, ln2_b, bo, b2, lnf_g, lnf_b
        pd.append(jnp.stack([Lr["ln1_g"], Lr["ln1_b"], Lr["ln2_g"], Lr["ln2_b"],
                             Lr["out_proj_b"], Lr["b2"], lnf_g, lnf_b],
                            axis=0).astype(jnp.float32))
    stack = lambda xs: jnp.stack(xs, axis=0)
    return dict(pos=raw["pos"], pd=stack(pd), wqkv=stack(wqkv), bqkv=stack(bqkv),
                wo=stack(wo), w1=stack(w1), b1=stack(b1), w2=stack(w2))


# ------------------------------ pure-JAX reference -----------------------------

def _ref_layernorm(x, g, b):
    mu = x.mean(-1, keepdims=True)
    xc = x - mu
    var = (xc * xc).mean(-1, keepdims=True)
    return xc / jnp.sqrt(var + EPS) * g + b


def reference_forward(x, raw, num_heads):
    B, S, D = x.shape
    H = num_heads
    Dh = D // H
    x = x + raw["pos"]
    for L in raw["layers"]:
        xn = _ref_layernorm(x, L["ln1_g"], L["ln1_b"])
        qkv = xn @ L["in_proj_w"].T + L["in_proj_b"]
        q, k, v = qkv[..., :D], qkv[..., D:2 * D], qkv[..., 2 * D:]
        heads = lambda t: t.reshape(B, S, H, Dh).transpose(0, 2, 1, 3)
        q, k, v = heads(q) / math.sqrt(Dh), heads(k), heads(v)
        p = jax.nn.softmax(jnp.einsum("bhqd,bhkd->bhqk", q, k), axis=-1)
        ctx = jnp.einsum("bhqk,bhkd->bhqd", p, v).transpose(0, 2, 1, 3).reshape(B, S, D)
        x = x + (ctx @ L["out_proj_w"].T + L["out_proj_b"])
        yn = _ref_layernorm(x, L["ln2_g"], L["ln2_b"])
        h = yn @ L["w1"].T + L["b1"]
        h = 0.5 * h * (1.0 + jnp.tanh(_SQRT_2_OVER_PI * (h + 0.044715 * h ** 3)))
        x = x + (h @ L["w2"].T + L["b2"])
    return _ref_layernorm(x, raw["ln_g"], raw["ln_b"])


# ----------------------------------- main --------------------------------------

if __name__ == "__main__":
    B, S, D, H, MLP_DIM, NUM_LAYERS = 2, 8, 32, 4, 64, 2

    key = jax.random.PRNGKey(0)
    kx, kp = jax.random.split(key)
    x = jax.random.normal(kx, (B, S, D), jnp.float32)
    raw = init_raw_params(kp, S, NUM_LAYERS, D, MLP_DIM)
    params = pack_params(raw, H)

    out = encoder_forward(x, params, H)
    jax.block_until_ready(out)
    assert out.shape == (B, S, D) and out.dtype == jnp.float32
    assert bool(jnp.all(jnp.isfinite(out)))

    ref = reference_forward(x, raw, H)
    err = float(jnp.max(jnp.abs(out - ref)))
    assert err < 1e-1, f"max abs err vs reference: {err}"
    print("KERNEL_OK")
</pallas_src>

<mosaic_0001>
module attributes {stable_mosaic.version = 11 : i64} {
  func.func @kernel(%arg0: i32, %arg1: i32, %arg2: memref<1x8x32xf32, #tpu.memory_space<vmem>>, %arg3: memref<1x8x32xf32, #tpu.memory_space<vmem>>, %arg4: memref<1x8x32xf32, #tpu.memory_space<vmem>>, %arg5: memref<1x32x96xbf16, #tpu.memory_space<vmem>>, %arg6: memref<1x1x96xf32, #tpu.memory_space<vmem>>, %arg7: memref<1x32x32xbf16, #tpu.memory_space<vmem>>, %arg8: memref<1x32x64xbf16, #tpu.memory_space<vmem>>, %arg9: memref<1x1x64xf32, #tpu.memory_space<vmem>>, %arg10: memref<1x64x32xbf16, #tpu.memory_space<vmem>>, %arg11: memref<1x8x32xf32, #tpu.memory_space<vmem>>, %arg12: memref<8x32xf32, #tpu.memory_space<vmem>>) attributes {dimension_semantics = [#tpu.dimension_semantics<parallel>, #tpu.dimension_semantics<arbitrary>], iteration_bounds = array<i64: 2, 2>, scalar_prefetch = 0 : i64, scratch_operands = 1 : i64, tpu.core_type = #tpu.core_type<tc>, window_params = [{transform_indices = @transform_0, window_bounds = array<i64: 1, 8, 32>}, {pipeline_mode = #tpu.pipeline_mode<synchronous>, transform_indices = @transform_1, window_bounds = array<i64: 1, 8, 32>}, {transform_indices = @transform_2, window_bounds = array<i64: 1, 8, 32>}, {transform_indices = @transform_3, window_bounds = array<i64: 1, 32, 96>}, {transform_indices = @transform_4, window_bounds = array<i64: 1, 1, 96>}, {transform_indices = @transform_5, window_bounds = array<i64: 1, 32, 32>}, {transform_indices = @transform_6, window_bounds = array<i64: 1, 32, 64>}, {transform_indices = @transform_7, window_bounds = array<i64: 1, 1, 64>}, {transform_indices = @transform_8, window_bounds = array<i64: 1, 64, 32>}, {transform_indices = @transform_9, window_bounds = array<i64: 1, 8, 32>}]} {
    %c0_i32 = arith.constant 0 : i32
    %0 = arith.cmpi eq, %arg1, %c0_i32 : i32
    %1 = arith.extui %0 : i1 to i32
    %c0_i32_0 = arith.constant 0 : i32
    %2 = arith.cmpi ne, %1, %c0_i32_0 : i32
    scf.if %2 {
      %c0_59 = arith.constant 0 : index
      %c0_60 = arith.constant 0 : index
      %c0_61 = arith.constant 0 : index
      %168 = vector.load %arg2[%c0_59, %c0_60, %c0_61] : memref<1x8x32xf32, #tpu.memory_space<vmem>>, vector<1x8x32xf32>
      %169 = vector.shape_cast %168 : vector<1x8x32xf32> to vector<8x32xf32>
      %c0_62 = arith.constant 0 : index
      %c0_63 = arith.constant 0 : index
      %c0_64 = arith.constant 0 : index
      %170 = vector.load %arg3[%c0_62, %c0_63, %c0_64] : memref<1x8x32xf32, #tpu.memory_space<vmem>>, vector<1x8x32xf32>
      %171 = vector.shape_cast %170 : vector<1x8x32xf32> to vector<8x32xf32>
      %172 = arith.addf %169, %171 : vector<8x32xf32>
      %c0_65 = arith.constant 0 : index
      %c0_66 = arith.constant 0 : index
      %173 = vector.load %arg12[%c0_65, %c0_66] : memref<8x32xf32, #tpu.memory_space<vmem>>, vector<8x32xf32>
      tpu.vector_store %arg12[%c0_65, %c0_66], %172 {strides = array<i32>} : memref<8x32xf32, #tpu.memory_space<vmem>>, vector<8x32xf32>,
    } else {
    }
    %c0 = arith.constant 0 : index
    %c0_1 = arith.constant 0 : index
    %3 = vector.load %arg12[%c0, %c0_1] : memref<8x32xf32, #tpu.memory_space<vmem>>, vector<8x32xf32>
    %c0_2 = arith.constant 0 : index
    %c0_3 = arith.constant 0 : index
    %c0_4 = arith.constant 0 : index
    %4 = vector.load %arg4[%c0_2, %c0_3, %c0_4] : memref<1x8x32xf32, #tpu.memory_space<vmem>>, vector<1x8x32xf32>
    %5 = vector.shape_cast %4 : vector<1x8x32xf32> to vector<8x32xf32>
    %6 = vector.extract_strided_slice %5 {offsets = [0, 0], sizes = [1, 32], strides = [1, 1]} : vector<8x32xf32> to vector<1x32xf32>
    %7 = vector.extract_strided_slice %5 {offsets = [1, 0], sizes = [1, 32], strides = [1, 1]} : vector<8x32xf32> to vector<1x32xf32>
    %8 = vector.extract_strided_slice %5 {offsets = [2, 0], sizes = [1, 32], strides = [1, 1]} : vector<8x32xf32> to vector<1x32xf32>
    %9 = vector.extract_strided_slice %5 {offsets = [3, 0], sizes = [1, 32], strides = [1, 1]} : vector<8x32xf32> to vector<1x32xf32>
    %10 = vector.extract_strided_slice %5 {offsets = [4, 0], sizes = [1, 32], strides = [1, 1]} : vector<8x32xf32> to vector<1x32xf32>
    %11 = vector.extract_strided_slice %5 {offsets = [5, 0], sizes = [1, 32], strides = [1, 1]} : vector<8x32xf32> to vector<1x32xf32>
    %cst = arith.constant dense<0.000000e+00> : vector<8xf32>
    %12 = vector.multi_reduction <add>, %3, %cst [1] : vector<8x32xf32> to vector<8xf32>
    %13 = vector.shape_cast %12 : vector<8xf32> to vector<8x1xf32>
    %cst_5 = arith.constant 3.200000e+01 : f32
    %14 = vector.broadcast %cst_5 : f32 to vector<8x1xf32>
    %15 = arith.divf %13, %14 : vector<8x1xf32>
    %16 = vector.broadcast %15 : vector<8x1xf32> to vector<8x32xf32>
    %17 = arith.subf %3, %16 : vector<8x32xf32>
    %18 = arith.mulf %17, %17 : vector<8x32xf32>
    %cst_6 = arith.constant dense<0.000000e+00> : vector<8xf32>
    %19 = vector.multi_reduction <add>, %18, %cst_6 [1] : vector<8x32xf32> to vector<8xf32>
    %20 = vector.shape_cast %19 : vector<8xf32> to vector<8x1xf32>
    %cst_7 = arith.constant 3.200000e+01 : f32
    %21 = vector.broadcast %cst_7 : f32 to vector<8x1xf32>
    %22 = arith.divf %20, %21 : vector<8x1xf32>
    %cst_8 = arith.constant 9.99999997E-7 : f32
    %23 = vector.broadcast %cst_8 : f32 to vector<8x1xf32>
    %24 = arith.addf %22, %23 : vector<8x1xf32>
    %25 = math.rsqrt %24 : vector<8x1xf32>
    %26 = vector.broadcast %25 : vector<8x1xf32> to vector<8x32xf32>
    %27 = arith.mulf %17, %26 : vector<8x32xf32>
    %28 = vector.broadcast %6 : vector<1x32xf32> to vector<8x32xf32>
    %29 = arith.mulf %27, %28 : vector<8x32xf32>
    %30 = vector.broadcast %7 : vector<1x32xf32> to vector<8x32xf32>
    %31 = arith.addf %29, %30 : vector<8x32xf32>
    %32 = arith.truncf %31 : vector<8x32xf32> to vector<8x32xbf16>
    %c0_9 = arith.constant 0 : index
    %c0_10 = arith.constant 0 : index
    %c0_11 = arith.constant 0 : index
    %33 = vector.load %arg5[%c0_9, %c0_10, %c0_11] : memref<1x32x96xbf16, #tpu.memory_space<vmem>>, vector<1x32x96xbf16>
    %34 = vector.shape_cast %33 : vector<1x32x96xbf16> to vector<32x96xbf16>
    %cst_12 = arith.constant dense<0.000000e+00> : vector<8x96xf32>
    %35 = tpu.matmul %32, %34, %cst_12 {dimension_numbers = #tpu.dot_dimension_numbers<[1], [0], [0], [1], [0, 0, 1, 1], [], []>} : vector<8x32xbf16>, vector<32x96xbf16>, vector<8x96xf32> -> vector<8x96xf32>
    %c0_13 = arith.constant 0 : index
    %c0_14 = arith.constant 0 : index
    %c0_15 = arith.constant 0 : index
    %36 = vector.load %arg6[%c0_13, %c0_14, %c0_15] : memref<1x1x96xf32, #tpu.memory_space<vmem>>, vector<1x1x96xf32>
    %37 = vector.shape_cast %36 : vector<1x1x96xf32> to vector<1x96xf32>
    %38 = vector.broadcast %37 : vector<1x96xf32> to vector<8x96xf32>
    %39 = arith.addf %35, %38 : vector<8x96xf32>
    %40 = arith.truncf %39 : vector<8x96xf32> to vector<8x96xbf16>
    %41 = vector.extract_strided_slice %40 {offsets = [0, 0], sizes = [8, 8], strides = [1, 1]} : vector<8x96xbf16> to vector<8x8xbf16>
    %42 = vector.extract_strided_slice %40 {offsets = [0, 32], sizes = [8, 8], strides = [1, 1]} : vector<8x96xbf16> to vector<8x8xbf16>
    %43 = vector.extract_strided_slice %40 {offsets = [0, 64], sizes = [8, 8], strides = [1, 1]} : vector<8x96xbf16> to vector<8x8xbf16>
    "tpu.trace_start"() <{level = 10 : i32, message = "qd,kd->qk"}> : () -> ()
    %cst_16 = arith.constant dense<0.000000e+00> : vector<8x8xf32>
    %44 = tpu.matmul %41, %42, %cst_16 {dimension_numbers = #tpu.dot_dimension_numbers<[1], [1], [0], [0], [0, 0, 1, 0], [], []>} : vector<8x8xbf16>, vector<8x8xbf16>, vector<8x8xf32> -> vector<8x8xf32>
    "tpu.trace_stop"() : () -> ()
    %cst_17 = arith.constant dense<0xFF800000> : vector<8xf32>
    %45 = vector.multi_reduction <maximumf>, %44, %cst_17 [1] : vector<8x8xf32> to vector<8xf32>
    %46 = vector.shape_cast %45 : vector<8xf32> to vector<8x1xf32>
    %47 = vector.broadcast %46 : vector<8x1xf32> to vector<8x8xf32>
    %48 = arith.subf %44, %47 : vector<8x8xf32>
    %49 = math.exp %48 : vector<8x8xf32>
    %cst_18 = arith.constant dense<0.000000e+00> : vector<8xf32>
    %50 = vector.multi_reduction <add>, %49, %cst_18 [1] : vector<8x8xf32> to vector<8xf32>
    %51 = vector.shape_cast %50 : vector<8xf32> to vector<8x1xf32>
    %52 = tpu.reciprocal %51 {approx = true} : vector<8x1xf32> -> vector<8x1xf32>
    %53 = vector.broadcast %52 : vector<8x1xf32> to vector<8x8xf32>
    %54 = arith.mulf %49, %53 : vector<8x8xf32>
    %55 = arith.truncf %54 : vector<8x8xf32> to vector<8x8xbf16>
    %cst_19 = arith.constant dense<0.000000e+00> : vector<8x8xf32>
    %56 = tpu.matmul %55, %43, %cst_19 {dimension_numbers = #tpu.dot_dimension_numbers<[1], [0], [0], [1], [0, 0, 1, 1], [], []>} : vector<8x8xbf16>, vector<8x8xbf16>, vector<8x8xf32> -> vector<8x8xf32>
    %57 = arith.truncf %56 : vector<8x8xf32> to vector<8x8xbf16>
    %58 = vector.extract_strided_slice %40 {offsets = [0, 8], sizes = [8, 8], strides = [1, 1]} : vector<8x96xbf16> to vector<8x8xbf16>
    %59 = vector.extract_strided_slice %40 {offsets = [0, 40], sizes = [8, 8], strides = [1, 1]} : vector<8x96xbf16> to vector<8x8xbf16>
    %60 = vector.extract_strided_slice %40 {offsets = [0, 72], sizes = [8, 8], strides = [1, 1]} : vector<8x96xbf16> to vector<8x8xbf16>
    "tpu.trace_start"() <{level = 10 : i32, message = "qd,kd->qk"}> : () -> ()
    %cst_20 = arith.constant dense<0.000000e+00> : vector<8x8xf32>
    %61 = tpu.matmul %58, %59, %cst_20 {dimension_numbers = #tpu.dot_dimension_numbers<[1], [1], [0], [0], [0, 0, 1, 0], [], []>} : vector<8x8xbf16>, vector<8x8xbf16>, vector<8x8xf32> -> vector<8x8xf32>
    "tpu.trace_stop"() : () -> ()
    %cst_21 = arith.constant dense<0xFF800000> : vector<8xf32>
    %62 = vector.multi_reduction <maximumf>, %61, %cst_21 [1] : vector<8x8xf32> to vector<8xf32>
    %63 = vector.shape_cast %62 : vector<8xf32> to vector<8x1xf32>
    %64 = vector.broadcast %63 : vector<8x1xf32> to vector<8x8xf32>
    %65 = arith.subf %61, %64 : vector<8x8xf32>
    %66 = math.exp %65 : vector<8x8xf32>
    %cst_22 = arith.constant dense<0.000000e+00> : vector<8xf32>
    %67 = vector.multi_reduction <add>, %66, %cst_22 [1] : vector<8x8xf32> to vector<8xf32>
    %68 = vector.shape_cast %67 : vector<8xf32> to vector<8x1xf32>
    %69 = tpu.reciprocal %68 {approx = true} : vector<8x1xf32> -> vector<8x1xf32>
    %70 = vector.broadcast %69 : vector<8x1xf32> to vector<8x8xf32>
    %71 = arith.mulf %66, %70 : vector<8x8xf32>
    %72 = arith.truncf %71 : vector<8x8xf32> to vector<8x8xbf16>
    %cst_23 = arith.constant dense<0.000000e+00> : vector<8x8xf32>
    %73 = tpu.matmul %72, %60, %cst_23 {dimension_numbers = #tpu.dot_dimension_numbers<[1], [0], [0], [1], [0, 0, 1, 1], [], []>} : vector<8x8xbf16>, vector<8x8xbf16>, vector<8x8xf32> -> vector<8x8xf32>
    %74 = arith.truncf %73 : vector<8x8xf32> to vector<8x8xbf16>
    %75 = vector.extract_strided_slice %40 {offsets = [0, 16], sizes = [8, 8], strides = [1, 1]} : vector<8x96xbf16> to vector<8x8xbf16>
    %76 = vector.extract_strided_slice %40 {offsets = [0, 48], sizes = [8, 8], strides = [1, 1]} : vector<8x96xbf16> to vector<8x8xbf16>
    %77 = vector.extract_strided_slice %40 {offsets = [0, 80], sizes = [8, 8], strides = [1, 1]} : vector<8x96xbf16> to vector<8x8xbf16>
    "tpu.trace_start"() <{level = 10 : i32, message = "qd,kd->qk"}> : () -> ()
    %cst_24 = arith.constant dense<0.000000e+00> : vector<8x8xf32>
    %78 = tpu.matmul %75, %76, %cst_24 {dimension_numbers = #tpu.dot_dimension_numbers<[1], [1], [0], [0], [0, 0, 1, 0], [], []>} : vector<8x8xbf16>, vector<8x8xbf16>, vector<8x8xf32> -> vector<8x8xf32>
    "tpu.trace_stop"() : () -> ()
    %cst_25 = arith.constant dense<0xFF800000> : vector<8xf32>
    %79 = vector.multi_reduction <maximumf>, %78, %cst_25 [1] : vector<8x8xf32> to vector<8xf32>
    %80 = vector.shape_cast %79 : vector<8xf32> to vector<8x1xf32>
    %81 = vector.broadcast %80 : vector<8x1xf32> to vector<8x8xf32>
    %82 = arith.subf %78, %81 : vector<8x8xf32>
    %83 = math.exp %82 : vector<8x8xf32>
    %cst_26 = arith.constant dense<0.000000e+00> : vector<8xf32>
    %84 = vector.multi_reduction <add>, %83, %cst_26 [1] : vector<8x8xf32> to vector<8xf32>
    %85 = vector.shape_cast %84 : vector<8xf32> to vector<8x1xf32>
    %86 = tpu.reciprocal %85 {approx = true} : vector<8x1xf32> -> vector<8x1xf32>
    %87 = vector.broadcast %86 : vector<8x1xf32> to vector<8x8xf32>
    %88 = arith.mulf %83, %87 : vector<8x8xf32>
    %89 = arith.truncf %88 : vector<8x8xf32> to vector<8x8xbf16>
    %cst_27 = arith.constant dense<0.000000e+00> : vector<8x8xf32>
    %90 = tpu.matmul %89, %77, %cst_27 {dimension_numbers = #tpu.dot_dimension_numbers<[1], [0], [0], [1], [0, 0, 1, 1], [], []>} : vector<8x8xbf16>, vector<8x8xbf16>, vector<8x8xf32> -> vector<8x8xf32>
    %91 = arith.truncf %90 : vector<8x8xf32> to vector<8x8xbf16>
    %92 = vector.extract_strided_slice %40 {offsets = [0, 24], sizes = [8, 8], strides = [1, 1]} : vector<8x96xbf16> to vector<8x8xbf16>
    %93 = vector.extract_strided_slice %40 {offsets = [0, 56], sizes = [8, 8], strides = [1, 1]} : vector<8x96xbf16> to vector<8x8xbf16>
    %94 = vector.extract_strided_slice %40 {offsets = [0, 88], sizes = [8, 8], strides = [1, 1]} : vector<8x96xbf16> to vector<8x8xbf16>
    "tpu.trace_start"() <{level = 10 : i32, message = "qd,kd->qk"}> : () -> ()
    %cst_28 = arith.constant dense<0.000000e+00> : vector<8x8xf32>
    %95 = tpu.matmul %92, %93, %cst_28 {dimension_numbers = #tpu.dot_dimension_numbers<[1], [1], [0], [0], [0, 0, 1, 0], [], []>} : vector<8x8xbf16>, vector<8x8xbf16>, vector<8x8xf32> -> vector<8x8xf32>
    "tpu.trace_stop"() : () -> ()
    %cst_29 = arith.constant dense<0xFF800000> : vector<8xf32>
    %96 = vector.multi_reduction <maximumf>, %95, %cst_29 [1] : vector<8x8xf32> to vector<8xf32>
    %97 = vector.shape_cast %96 : vector<8xf32> to vector<8x1xf32>
    %98 = vector.broadcast %97 : vector<8x1xf32> to vector<8x8xf32>
    %99 = arith.subf %95, %98 : vector<8x8xf32>
    %100 = math.exp %99 : vector<8x8xf32>
    %cst_30 = arith.constant dense<0.000000e+00> : vector<8xf32>
    %101 = vector.multi_reduction <add>, %100, %cst_30 [1] : vector<8x8xf32> to vector<8xf32>
    %102 = vector.shape_cast %101 : vector<8xf32> to vector<8x1xf32>
    %103 = tpu.reciprocal %102 {approx = true} : vector<8x1xf32> -> vector<8x1xf32>
    %104 = vector.broadcast %103 : vector<8x1xf32> to vector<8x8xf32>
    %105 = arith.mulf %100, %104 : vector<8x8xf32>
    %106 = arith.truncf %105 : vector<8x8xf32> to vector<8x8xbf16>
    %cst_31 = arith.constant dense<0.000000e+00> : vector<8x8xf32>
    %107 = tpu.matmul %106, %94, %cst_31 {dimension_numbers = #tpu.dot_dimension_numbers<[1], [0], [0], [1], [0, 0, 1, 1], [], []>} : vector<8x8xbf16>, vector<8x8xbf16>, vector<8x8xf32> -> vector<8x8xf32>
    %108 = arith.truncf %107 : vector<8x8xf32> to vector<8x8xbf16>
    %109 = tpu.concatenate %57, %74, %91, %108 in 1 : vector<8x8xbf16>, vector<8x8xbf16>, vector<8x8xbf16>, vector<8x8xbf16> -> vector<8x32xbf16>
    %c0_32 = arith.constant 0 : index
    %c0_33 = arith.constant 0 : index
    %c0_34 = arith.constant 0 : index
    %110 = vector.load %arg7[%c0_32, %c0_33, %c0_34] : memref<1x32x32xbf16, #tpu.memory_space<vmem>>, vector<1x32x32xbf16>
    %111 = vector.shape_cast %110 : vector<1x32x32xbf16> to vector<32x32xbf16>
    %cst_35 = arith.constant dense<0.000000e+00> : vector<8x32xf32>
    %112 = tpu.matmul %109, %111, %cst_35 {dimension_numbers = #tpu.dot_dimension_numbers<[1], [0], [0], [1], [0, 0, 1, 1], [], []>} : vector<8x32xbf16>, vector<32x32xbf16>, vector<8x32xf32> -> vector<8x32xf32>
    %113 = vector.broadcast %10 : vector<1x32xf32> to vector<8x32xf32>
    %114 = arith.addf %112, %113 : vector<8x32xf32>
    %115 = arith.addf %3, %114 : vector<8x32xf32>
    %cst_36 = arith.constant dense<0.000000e+00> : vector<8xf32>
    %116 = vector.multi_reduction <add>, %115, %cst_36 [1] : vector<8x32xf32> to vector<8xf32>
    %117 = vector.shape_cast %116 : vector<8xf32> to vector<8x1xf32>
    %cst_37 = arith.constant 3.200000e+01 : f32
    %118 = vector.broadcast %cst_37 : f32 to vector<8x1xf32>
    %119 = arith.divf %117, %118 : vector<8x1xf32>
    %120 = vector.broadcast %119 : vector<8x1xf32> to vector<8x32xf32>
    %121 = arith.subf %115, %120 : vector<8x32xf32>
    %122 = arith.mulf %121, %121 : vector<8x32xf32>
    %cst_38 = arith.constant dense<0.000000e+00> : vector<8xf32>
    %123 = vector.multi_reduction <add>, %122, %cst_38 [1] : vector<8x32xf32> to vector<8xf32>
    %124 = vector.shape_cast %123 : vector<8xf32> to vector<8x1xf32>
    %cst_39 = arith.constant 3.200000e+01 : f32
    %125 = vector.broadcast %cst_39 : f32 to vector<8x1xf32>
    %126 = arith.divf %124, %125 : vector<8x1xf32>
    %cst_40 = arith.constant 9.99999997E-7 : f32
    %127 = vector.broadcast %cst_40 : f32 to vector<8x1xf32>
    %128 = arith.addf %126, %127 : vector<8x1xf32>
    %129 = math.rsqrt %128 : vector<8x1xf32>
    %130 = vector.broadcast %129 : vector<8x1xf32> to vector<8x32xf32>
    %131 = arith.mulf %121, %130 : vector<8x32xf32>
    %132 = vector.broadcast %8 : vector<1x32xf32> to vector<8x32xf32>
    %133 = arith.mulf %131, %132 : vector<8x32xf32>
    %134 = vector.broadcast %9 : vector<1x32xf32> to vector<8x32xf32>
    %135 = arith.addf %133, %134 : vector<8x32xf32>
    %136 = arith.truncf %135 : vector<8x32xf32> to vector<8x32xbf16>
    %c0_41 = arith.constant 0 : index
    %c0_42 = arith.constant 0 : index
    %c0_43 = arith.constant 0 : index
    %137 = vector.load %arg8[%c0_41, %c0_42, %c0_43] : memref<1x32x64xbf16, #tpu.memory_space<vmem>>, vector<1x32x64xbf16>
    %138 = vector.shape_cast %137 : vector<1x32x64xbf16> to vector<32x64xbf16>
    %cst_44 = arith.constant dense<0.000000e+00> : vector<8x64xf32>
    %139 = tpu.matmul %136, %138, %cst_44 {dimension_numbers = #tpu.dot_dimension_numbers<[1], [0], [0], [1], [0, 0, 1, 1], [], []>} : vector<8x32xbf16>, vector<32x64xbf16>, vector<8x64xf32> -> vector<8x64xf32>
    %c0_45 = arith.constant 0 : index
    %c0_46 = arith.constant 0 : index
    %c0_47 = arith.constant 0 : index
    %140 = vector.load %arg9[%c0_45, %c0_46, %c0_47] : memref<1x1x64xf32, #tpu.memory_space<vmem>>, vector<1x1x64xf32>
    %141 = vector.shape_cast %140 : vector<1x1x64xf32> to vector<1x64xf32>
    %142 = vector.broadcast %141 : vector<1x64xf32> to vector<8x64xf32>
    %143 = arith.addf %139, %142 : vector<8x64xf32>
    %cst_48 = arith.constant 5.000000e-01 : f32
    %144 = vector.broadcast %cst_48 : f32 to vector<8x64xf32>
    %145 = arith.mulf %144, %143 : vector<8x64xf32>
    %cst_49 = arith.constant 4.471500e-02 : f32
    %146 = vector.broadcast %cst_49 : f32 to vector<8x64xf32>
    %147 = arith.mulf %146, %143 : vector<8x64xf32>
    %148 = arith.mulf %147, %143 : vector<8x64xf32>
    %149 = arith.mulf %148, %143 : vector<8x64xf32>
    %150 = arith.addf %143, %149 : vector<8x64xf32>
    %cst_50 = arith.constant 0.797884583 : f32
    %151 = vector.broadcast %cst_50 : f32 to vector<8x64xf32>
    %152 = arith.mulf %151, %150 : vector<8x64xf32>
    %153 = math.tanh %152 : vector<8x64xf32>
    %cst_51 = arith.constant 1.000000e+00 : f32
    %154 = vector.broadcast %cst_51 : f32 to vector<8x64xf32>
    %155 = arith.addf %154, %153 : vector<8x64xf32>
    %156 = arith.mulf %145, %155 : vector<8x64xf32>
    %157 = arith.truncf %156 : vector<8x64xf32> to vector<8x64xbf16>
    %c0_52 = arith.constant 0 : index
    %c0_53 = arith.constant 0 : index
    %c0_54 = arith.constant 0 : index
    %158 = vector.load %arg10[%c0_52, %c0_53, %c0_54] : memref<1x64x32xbf16, #tpu.memory_space<vmem>>, vector<1x64x32xbf16>
    %159 = vector.shape_cast %158 : vector<1x64x32xbf16> to vector<64x32xbf16>
    %cst_55 = arith.constant dense<0.000000e+00> : vector<8x32xf32>
    %160 = tpu.matmul %157, %159, %cst_55 {dimension_numbers = #tpu.dot_dimension_numbers<[1], [0], [0], [1], [0, 0, 1, 1], [], []>} : vector<8x64xbf16>, vector<64x32xbf16>, vector<8x32xf32> -> vector<8x32xf32>
    %161 = vector.broadcast %11 : vector<1x32xf32> to vector<8x32xf32>
    %162 = arith.addf %160, %161 : vector<8x32xf32>
    %163 = arith.addf %115, %162 : vector<8x32xf32>
    %c0_56 = arith.constant 0 : index
    %c0_57 = arith.constant 0 : index
    %164 = vector.load %arg12[%c0_56, %c0_57] : memref<8x32xf32, #tpu.memory_space<vmem>>, vector<8x32xf32>
    tpu.vector_store %arg12[%c0_56, %c0_57], %163 {strides = array<i32>} : memref<8x32xf32, #tpu.memory_space<vmem>>, vector<8x32xf32>,
    %c1_i32 = arith.constant 1 : i32
    %165 = arith.cmpi eq, %arg1, %c1_i32 : i32
    %166 = arith.extui %165 : i1 to i32
    %c0_i32_58 = arith.constant 0 : i32
    %167 = arith.cmpi ne, %166, %c0_i32_58 : i32
    scf.if %167 {
      %168 = vector.extract_strided_slice %5 {offsets = [6, 0], sizes = [1, 32], strides = [1, 1]} : vector<8x32xf32> to vector<1x32xf32>
      %169 = vector.extract_strided_slice %5 {offsets = [7, 0], sizes = [1, 32], strides = [1, 1]} : vector<8x32xf32> to vector<1x32xf32>
      %cst_59 = arith.constant dense<0.000000e+00> : vector<8xf32>
      %170 = vector.multi_reduction <add>, %163, %cst_59 [1] : vector<8x32xf32> to vector<8xf32>
      %171 = vector.shape_cast %170 : vector<8xf32> to vector<8x1xf32>
      %cst_60 = arith.constant 3.200000e+01 : f32
      %172 = vector.broadcast %cst_60 : f32 to vector<8x1xf32>
      %173 = arith.divf %171, %172 : vector<8x1xf32>
      %174 = vector.broadcast %173 : vector<8x1xf32> to vector<8x32xf32>
      %175 = arith.subf %163, %174 : vector<8x32xf32>
      %176 = arith.mulf %175, %175 : vector<8x32xf32>
      %cst_61 = arith.constant dense<0.000000e+00> : vector<8xf32>
      %177 = vector.multi_reduction <add>, %176, %cst_61 [1] : vector<8x32xf32> to vector<8xf32>
      %178 = vector.shape_cast %177 : vector<8xf32> to vector<8x1xf32>
      %cst_62 = arith.constant 3.200000e+01 : f32
      %179 = vector.broadcast %cst_62 : f32 to vector<8x1xf32>
      %180 = arith.divf %178, %179 : vector<8x1xf32>
      %cst_63 = arith.constant 9.99999997E-7 : f32
      %181 = vector.broadcast %cst_63 : f32 to vector<8x1xf32>
      %182 = arith.addf %180, %181 : vector<8x1xf32>
      %183 = math.rsqrt %182 : vector<8x1xf32>
      %184 = vector.broadcast %183 : vector<8x1xf32> to vector<8x32xf32>
      %185 = arith.mulf %175, %184 : vector<8x32xf32>
      %186 = vector.broadcast %168 : vector<1x32xf32> to vector<8x32xf32>
      %187 = arith.mulf %185, %186 : vector<8x32xf32>
      %188 = vector.broadcast %169 : vector<1x32xf32> to vector<8x32xf32>
      %189 = arith.addf %187, %188 : vector<8x32xf32>
      %c0_64 = arith.constant 0 : index
      %c0_65 = arith.constant 0 : index
      %c0_66 = arith.constant 0 : index
      %190 = vector.load %arg11[%c0_64, %c0_65, %c0_66] : memref<1x8x32xf32, #tpu.memory_space<vmem>>, vector<1x8x32xf32>
      %191 = vector.shape_cast %190 : vector<1x8x32xf32> to vector<8x32xf32>
      %192 = vector.shape_cast %189 : vector<8x32xf32> to vector<1x8x32xf32>
      tpu.vector_store %arg11[%c0_64, %c0_65, %c0_66], %192 {strides = array<i32>} : memref<1x8x32xf32, #tpu.memory_space<vmem>>, vector<1x8x32xf32>,
    } else {
    }
    return
  }
  func.func @transform_0(%arg0: i32, %arg1: i32) -> (i32, i32, i32) {
    %c0_i32 = arith.constant 0 : i32
    %c0_i32_0 = arith.constant 0 : i32
    %c0_i32_1 = arith.constant 0 : i32
    return %arg0, %c0_i32, %c0_i32_0 : i32, i32, i32
  }
  func.func @transform_1(%arg0: i32, %arg1: i32) -> (i32, i32, i32) {
    %c0_i32 = arith.constant 0 : i32
    %c0_i32_0 = arith.constant 0 : i32
    %c0_i32_1 = arith.constant 0 : i32
    %c0_i32_2 = arith.constant 0 : i32
    return %c0_i32, %c0_i32_0, %c0_i32_1 : i32, i32, i32
  }
  func.func @transform_2(%arg0: i32, %arg1: i32) -> (i32, i32, i32) {
    %c0_i32 = arith.constant 0 : i32
    %c0_i32_0 = arith.constant 0 : i32
    %c0_i32_1 = arith.constant 0 : i32
    return %arg1, %c0_i32, %c0_i32_0 : i32, i32, i32
  }
  func.func @transform_3(%arg0: i32, %arg1: i32) -> (i32, i32, i32) {
    %c0_i32 = arith.constant 0 : i32
    %c0_i32_0 = arith.constant 0 : i32
    %c0_i32_1 = arith.constant 0 : i32
    return %arg1, %c0_i32, %c0_i32_0 : i32, i32, i32
  }
  func.func @transform_4(%arg0: i32, %arg1: i32) -> (i32, i32, i32) {
    %c0_i32 = arith.constant 0 : i32
    %c0_i32_0 = arith.constant 0 : i32
    %c0_i32_1 = arith.constant 0 : i32
    return %arg1, %c0_i32, %c0_i32_0 : i32, i32, i32
  }
  func.func @transform_5(%arg0: i32, %arg1: i32) -> (i32, i32, i32) {
    %c0_i32 = arith.constant 0 : i32
    %c0_i32_0 = arith.constant 0 : i32
    %c0_i32_1 = arith.constant 0 : i32
    return %arg1, %c0_i32, %c0_i32_0 : i32, i32, i32
  }
  func.func @transform_6(%arg0: i32, %arg1: i32) -> (i32, i32, i32) {
    %c0_i32 = arith.constant 0 : i32
    %c0_i32_0 = arith.constant 0 : i32
    %c0_i32_1 = arith.constant 0 : i32
    return %arg1, %c0_i32, %c0_i32_0 : i32, i32, i32
  }
  func.func @transform_7(%arg0: i32, %arg1: i32) -> (i32, i32, i32) {
    %c0_i32 = arith.constant 0 : i32
    %c0_i32_0 = arith.constant 0 : i32
    %c0_i32_1 = arith.constant 0 : i32
    return %arg1, %c0_i32, %c0_i32_0 : i32, i32, i32
  }
  func.func @transform_8(%arg0: i32, %arg1: i32) -> (i32, i32, i32) {
    %c0_i32 = arith.constant 0 : i32
    %c0_i32_0 = arith.constant 0 : i32
    %c0_i32_1 = arith.constant 0 : i32
    return %arg1, %c0_i32, %c0_i32_0 : i32, i32, i32
  }
  func.func @transform_9(%arg0: i32, %arg1: i32) -> (i32, i32, i32) {
    %c0_i32 = arith.constant 0 : i32
    %c0_i32_0 = arith.constant 0 : i32
    %c0_i32_1 = arith.constant 0 : i32
    return %arg0, %c0_i32, %c0_i32_0 : i32, i32, i32
  }
}

</mosaic_0001>

<bundles_post_ra>
// kernel: tpu_custom_call.1
= control target key start
LH: loop header
LB: loop body
LE: loop exit
PB: predicated region body
PF: predicated region fallthrough
CT: control target
= control target key end

     0   :  { %s3244_s0 = inlined_call_operand.hbm [shape: f32[2,8,32], index: 0, kind: input, shape index: {}]   ;;  %s3245_s1 = inlined_call_operand.hbm [shape: f32[1,8,32], index: 1, kind: input, shape index: {}]   ;;  %s3246_s2 = inlined_call_operand.hbm [shape: f32[2,8,32], index: 2, kind: input, shape index: {}]   ;;  %s3247_s3 = inlined_call_operand.hbm [shape: bf16[2,32,96], index: 3, kind: input, shape index: {}]   ;;  %s3248_s4 = inlined_call_operand.hbm [shape: f32[2,1,96], index: 4, kind: input, shape index: {}]   ;;  %s3249_s5 = inlined_call_operand.hbm [shape: bf16[2,32,32], index: 5, kind: input, shape index: {}]   ;;  %s3250_s6 = inlined_call_operand.hbm [shape: bf16[2,32,64], index: 6, kind: input, shape index: {}]   ;;  %s3251_s7 = inlined_call_operand.hbm [shape: f32[2,1,64], index: 7, kind: input, shape index: {}]   ;;  %s3252_s8 = inlined_call_operand.hbm [shape: bf16[2,64,32], index: 8, kind: input, shape index: {}]   ;;  %s3253_s9 = inlined_call_operand.hbm [shape: f32[2,8,32], index: 9, kind: output, shape index: {}]  }
   0x1   :  { %3274 = sst [smem:[#allocation29_spill]] %s3244_s0 }
   0x2   :  { %3275 = sst [smem:[#allocation30_spill]] %s3245_s1 }
   0x3   :  { %3276 = sst [smem:[#allocation31_spill]] %s3246_s2 }
   0x4   :  { %3277 = sst [smem:[#allocation32_spill]] %s3247_s3 }
   0x5   :  { %3278 = sst [smem:[#allocation33_spill]] %s3248_s4 }
   0x6   :  { %3279 = sst [smem:[#allocation34_spill]] %s3252_s8 }
   0x7   :  { %3280 = sst [smem:[#allocation35_spill]] %s3253_s9 }
   0x8   :  { %14 = vsyncpa [#allocation4], 0 }
   0x9   :  { %16 = vsyncpa [#allocation4 + $0x1], 0 }
   0xa   :  { %17 = vsyncpa [#allocation7], 0 }
   0xb   :  { %18 = vsyncpa [#allocation5], 0 }
   0xc   :  { %20 = vsyncpa [#allocation5 + $0x1], 0  ;;  %s2555_s30 = smov 0   ;;  %s2557_s10 = smov 0  }
   0xd   :  { %s2559_s11 = smov 0   ;;  %s2561_s12 = smov 0  }
   0xe   :  { %s2563_s13 = smov 0   ;;  %s2565_s14 = smov 0  }
   0xf   :  { %s2567_s15 = smov 0   ;;  %s2569_s16 = smov 0  }
  0x10   :  { %s2571_s17 = smov 0   ;;  %s2573_s18 = smov 0  }
  0x11   :  { %s2575_s19 = smov 0  }
  0x12 LB: > { %3281 = sst [smem:[#allocation20_spill]] %s2443_s11  ;;  %s35_s20 = sadd.s32 1, %s2467_s17  ;;  %s2475_s19 = sphi %s2575_s19, %s26_s19   ;;  %s2471_s18 = sphi %s2573_s18, %s3339_s18   ;;  %s2467_s17 = sphi %s2571_s17, %s3338_s17   ;;  %s2463_s16 = sphi %s2569_s16, %s3330_s16   ;;  %s2459_s15 = sphi %s2567_s15, %s3337_s15   ;;  %s2455_s14 = sphi %s2565_s14, %s3329_s14   ;;  %s2451_s13 = sphi %s2563_s13, %s3336_s13   ;;  %s2447_s12 = sphi %s2561_s12, %s3335_s12   ;;  %s2443_s11 = sphi %s2559_s11, %s3327_s11   ;;  %s2439_s10 = sphi %s2557_s10, %s3334_s10   ;;  %s2435_s30 = sphi %s2555_s30, %s3333_s30  }
  0x13   : > { %3282 = sst [smem:[#allocation21_spill]] %s2455_s14  ;;  %s38_s21 = sadd.s32 1, %s2471_s18 }
  0x14   : > { %3283 = sst [smem:[#allocation22_spill]] %s2459_s15  ;;  %p36_p0 = scmp.ge.s32.totalorder %s35_s20, 2 }
  0x15   : > { %3284 = sst [smem:[#allocation23_spill]] %s2463_s16  ;;  %s45_s22 = sadd.s32 1, %s2455_s14 }
  0x16   : > { %3285 = sst [smem:[#allocation24_spill]] %s2471_s18  ;;  %p3258_p1 = scmp.ne.s32.totalorder %s2455_s14, %s2451_s13 }
  0x17   : > { %p53_p2 = scmp.eq.s32.totalorder %s2475_s19, 0  ;;  %s3341_s20 = smov (%p36_p0, %s35_s20), 0 }
  0x18   : > { %3286 = sst [smem:[#allocation25_spill]] %s3341_s20  ;;  %s3343_s21 = smov (!%p36_p0, %s38_s21), %s2471_s18 }
  0x19   : > { %p2622_p3 = por %p53_p2, %p3258_p1  ;;  %s89_s24 = ssub.s32 %s2467_s17, %s3341_s20 }
  0x1a   : > { %p40_p4 = scmp.ge.s32.totalorder %s3343_s21, 2  ;;  %p90_p5 = scmp.eq.s32.totalorder %s89_s24, 0 }
  0x1b   : > { %s92_s25 = sadd.s32 1, %s2443_s11  ;;  %p99_p6 = scmp.ne.s32.totalorder %s2443_s11, %s2439_s10 }
  0x1c   : > { %s3345_s21 = smov (%p40_p4, %s3343_s21), 0  ;;  %p1933_p9 = scmp.lt.s32.totalorder %s2475_s19, 4 }
  0x1d   : > { %3288 = sst [smem:[#allocation26_spill]] %s3345_s21  ;;  %s42_s27 = ssub.s32 %s2471_s18, %s3345_s21 }
  0x1e   : > { %s2634_s26 = scalar_select %p90_p5, %s2443_s11, %s92_s25  }
  0x1f   : > { %p2638_p7 = por %p99_p6, %p53_p2  ;;  %p43_p8 = scmp.eq.s32.totalorder %s42_s27, 0 }
  0x20   : > { %3289 = sst [smem:[#allocation27_spill]] %s2634_s26  ;;  %s322_s29 = sand.u32 1, %s2475_s19  }
  0x21   : > { %s2645_s20 = scalar_select %p43_p8, %s2455_s14, %s45_s22  }
  0x22   : > { %s324_s24 = sand.u32 1, %s2455_s14   ;;  %s1703_s16 = sshll.u32 %s2471_s18, 7 }
  0x23   : > { %3291 = sst [smem:[#allocation28_spill]] %s2645_s20  ;;  %s1702_s9 = sshll.u32 %s324_s24, 3 }
  0x24   : > { %s3292_s0 = sld [smem:[#allocation29_spill]]  ;;  %s326_s21 = scalar_lea.vmem [#allocation3], %s1702_s9 }
  0x25   : > { %s333_s26 = sshll.u32 %s326_s21, 4  ;;  %p2656_p10 = pnand %p1933_p9, %p2622_p3  ;;  %s2660_s26 = int_to_ptr.vmem [resolvable:$true] %s333_s26 }
  0x26   : > { %p2664_p11 = pnand %p1933_p9, %p2638_p7  ;;  %s2669_s15 = sand.u32 1, %s2443_s11  }
  0x27   : > { %p2079_p13 = pneg %p2656_p10 }
  0x28   : > { %s3294_s1 = scalar_select %p2664_p11, 1, 0 }
  0x2a   : > { %s2652_s25 = scalar_lea.hbm %s3292_s0, %s1703_s16  ;;  %s2671_s16 = scalar_lea.sflag [#allocation4], %s322_s29 }
  0x2b   : > { %s2077_s9 = scalar_lea.hbm %s2652_s25, 128  ;;  %s2082_s23 = scalar_lea.hbm %s3292_s0, 256 }
  0x2c   : > { %p2078_p12 = scmp.ne.s32.totalorder %s2652_s25, %s2077_s9  ;;  %p2083_p3 = scmp.lt.u32.totalorder %s2652_s25, %s3292_s0 }
  0x2d   : > { %p2084_p4 = scmp.lt.u32.totalorder %s2082_s23, %s2077_s9  ;;  %p2086_p6 = scmp.lt.u32.totalorder %s2077_s9, %s2652_s25 }
  0x2e   : > { %p2080_p0 = pnand %p2079_p13, %p2078_p12 }
  0x2f   : > { %p2085_p5 = por %p2084_p4, %p2083_p3 }
  0x30   : > { %p2081_p2 = pneg %p2080_p0 }
  0x31   : > { %p2087_p7 = por %p2086_p6, %p2085_p5 }
  0x33   : > { %p2088_p8 = pnand %p2087_p7, %p2081_p2 }
  0x35   : > { %2091 = shalt.err (!%p2088_p8)
}
  0x36   : > { %s2092_s29 = scalar_lea.vmem %s2660_s26, 128  ;;  %s2477_s21 = smov [#allocation3]  }
  0x37   : > { %p2093_p9 = scmp.ne.s32.totalorder %s2660_s26, %s2092_s29  ;;  %s2097_s22 = sshll.u32 %s2477_s21, 4  ;;  %s2098_s22 = int_to_ptr.vmem [resolvable:$false] %s2097_s22 }
  0x38   : > { %s2099_s28 = scalar_lea.vmem %s2098_s22, 256  ;;  %p2100_p1 = scmp.lt.s32.totalorder %s2660_s26, %s2098_s22 }
  0x39   : > { %p2095_p12 = pnand %p2093_p9, %p2079_p13  ;;  %p2101_p3 = scmp.lt.s32.totalorder %s2099_s28, %s2092_s29 }
  0x3b   : > { %p2096_p0 = pneg %p2095_p12  ;;  %p2102_p4 = por %p2101_p3, %p2100_p1 }
  0x3d   : > { %p2103_p5 = pnand %p2102_p4, %p2096_p0 }
  0x3f   : > { %2106 = shalt.err (!%p2103_p5)
}
  0x40   : > { %1906 = dma.hbm_to_vmem [thread:$0]  (!%p2656_p10), %s2652_s25, 128, %s2660_s26, %s2671_s16  }
  0x41   : > { %s1704_s9 = sshll.u32 %s2669_s15, 3  ;;  %s1705_s23 = sshll.u32 %s2467_s17, 7 }
  0x42   : > { %s3295_s2 = sld [smem:[#allocation31_spill]]  ;;  %s344_s27 = scalar_lea.vmem [#allocation8], %s1704_s9 }
  0x43   : > { %s351_s29 = sshll.u32 %s344_s27, 4  ;;  %s2709_s28 = sshll.u32 %s2669_s15, 4  ;;  %s2706_s29 = int_to_ptr.vmem [resolvable:$true] %s351_s29 }
  0x44   : > { %p2715_p10 = pneg %p2664_p11 }
  0x48   : > { %s2704_s22 = scalar_lea.hbm %s3295_s2, %s1705_s23  ;;  %s2112_s9 = scalar_lea.hbm %s3295_s2, 256 }
  0x49   : > { %s2107_s0 = scalar_lea.hbm %s2704_s22, 128  ;;  %p2113_p6 = scmp.lt.u32.totalorder %s2704_s22, %s3295_s2 }
  0x4a   : > { %p2108_p1 = scmp.ne.s32.totalorder %s2704_s22, %s2107_s0  ;;  %p2114_p7 = scmp.lt.u32.totalorder %s2112_s9, %s2107_s0 }
  0x4b   : > { %p2116_p9 = scmp.lt.u32.totalorder %s2107_s0, %s2704_s22 }
  0x4c   : > { %p2110_p13 = pnand %p2715_p10, %p2108_p1  ;;  %p2115_p8 = por %p2114_p7, %p2113_p6 }
  0x4e   : > { %p2111_p2 = pneg %p2110_p13  ;;  %p2117_p12 = por %p2116_p9, %p2115_p8 }
  0x50   : > { %p2118_p0 = pnand %p2117_p12, %p2111_p2 }
  0x52   : > { %2121 = shalt.err (!%p2118_p0)
}
  0x53   : > { %s2122_s27 = scalar_lea.vmem %s2706_s29, 128  ;;  %s2478_s25 = smov [#allocation8]  }
  0x54   : > { %p2123_p3 = scmp.ne.s32.totalorder %s2706_s29, %s2122_s27  ;;  %s2127_s23 = sshll.u32 %s2478_s25, 4  ;;  %s2128_s23 = int_to_ptr.vmem [resolvable:$false] %s2127_s23 }
  0x55   : > { %s2129_s24 = scalar_lea.vmem %s2128_s23, 256  ;;  %p2130_p1 = scmp.lt.s32.totalorder %s2706_s29, %s2128_s23 }
  0x56   : > { %p2125_p4 = pnand %p2123_p3, %p2715_p10  ;;  %p2131_p13 = scmp.lt.s32.totalorder %s2129_s24, %s2122_s27 }
  0x58   : > { %p2126_p5 = pneg %p2125_p4  ;;  %p2132_p6 = por %p2131_p13, %p2130_p1 }
  0x5a   : > { %p2133_p7 = pnand %p2132_p6, %p2126_p5 }
  0x5c   : > { %2136 = shalt.err (!%p2133_p7)
}
  0x5d   : > { %1909 = dma.hbm_to_vmem [thread:$0]  (!%p2664_p11), %s2704_s22, 128, %s2706_s29, %s2671_s16  }
  0x5e   : > { %s2740_s0 = sshll.u32 %s2467_s17, 8  ;;  %s3297_s3 = sld [smem:[#allocation32_spill]] }
  0x5f   : > { %s362_s27 = scalar_lea.vmem [#allocation9], %s2709_s28 }
  0x60   : > { %s369_s23 = sshll.u32 %s362_s27, 4  ;;  %s2749_s23 = int_to_ptr.vmem [resolvable:$true] %s369_s23 }
  0x64   : > { %s2746_s25 = scalar_lea.hbm %s3297_s3, %s2740_s0  ;;  %s2142_s2 = scalar_lea.hbm %s3297_s3, 512 }
  0x65   : > { %s2137_s24 = scalar_lea.hbm %s2746_s25, 256  ;;  %p2143_p12 = scmp.lt.u32.totalorder %s2746_s25, %s3297_s3 }
  0x66   : > { %p2138_p2 = scmp.ne.s32.totalorder %s2746_s25, %s2137_s24  ;;  %p2144_p0 = scmp.lt.u32.totalorder %s2142_s2, %s2137_s24 }
  0x67   : > { %p2146_p4 = scmp.lt.u32.totalorder %s2137_s24, %s2746_s25 }
  0x68   : > { %p2140_p8 = pnand %p2138_p2, %p2715_p10  ;;  %p2145_p3 = por %p2144_p0, %p2143_p12 }
  0x6a   : > { %p2141_p9 = pneg %p2140_p8  ;;  %p2147_p5 = por %p2146_p4, %p2145_p3 }
  0x6c   : > { %p2148_p1 = pnand %p2147_p5, %p2141_p9 }
  0x6e   : > { %2151 = shalt.err (!%p2148_p1)
}
  0x6f   : > { %s2152_s27 = scalar_lea.vmem %s2749_s23, 256  ;;  %s2479_s22 = smov [#allocation9]  }
  0x70   : > { %p2153_p13 = scmp.ne.s32.totalorder %s2749_s23, %s2152_s27  ;;  %s2157_s29 = sshll.u32 %s2479_s22, 4  ;;  %s2158_s29 = int_to_ptr.vmem [resolvable:$false] %s2157_s29 }
  0x71   : > { %s2159_s9 = scalar_lea.vmem %s2158_s29, 512  ;;  %p2160_p2 = scmp.lt.s32.totalorder %s2749_s23, %s2158_s29 }
  0x72   : > { %p2155_p6 = pnand %p2153_p13, %p2715_p10  ;;  %p2161_p8 = scmp.lt.s32.totalorder %s2159_s9, %s2152_s27 }
  0x74   : > { %p2156_p7 = pneg %p2155_p6  ;;  %p2162_p12 = por %p2161_p8, %p2160_p2 }
  0x76   : > { %p2163_p0 = pnand %p2162_p12, %p2156_p7 }
  0x78   : > { %2166 = shalt.err (!%p2163_p0)
}
  0x79   : > { %s3267_s2 = smov 64   ;;  %s3268_s24 = smov 4  }
  0x7a   : > { %1912 = dma.hbm_to_vmem [thread:$0]  (!%p2664_p11), %s2746_s25, 256, %s2749_s23, %s2671_s16, %s3267_s2, %s3267_s2, %s3268_s24  }
  0x7b   : > { %s1709_s21 = sshll.u32 %s2467_s17, 4  ;;  %s382_s27 = scalar_lea.vmem [#allocation10], %s2669_s15 }
  0x7c   : > { %s389_s22 = sshll.u32 %s382_s27, 4  ;;  %s3298_s4 = sld [smem:[#allocation33_spill]]  ;;  %s390_s22 = int_to_ptr.vmem [resolvable:$true] %s389_s22 }
  0x82   : > { %s387_s3 = scalar_lea.hbm %s3298_s4, %s1709_s21  ;;  %s2172_s8 = scalar_lea.hbm %s3298_s4, 32 }
  0x83   : > { %s2167_s18 = scalar_lea.hbm %s387_s3, 16  ;;  %p2173_p5 = scmp.lt.u32.totalorder %s387_s3, %s3298_s4 }
  0x84   : > { %p2168_p9 = scmp.ne.s32.totalorder %s387_s3, %s2167_s18  ;;  %p2174_p1 = scmp.lt.u32.totalorder %s2172_s8, %s2167_s18 }
  0x85   : > { %p2176_p6 = scmp.lt.u32.totalorder %s2167_s18, %s387_s3 }
  0x86   : > { %p2170_p3 = pnand %p2168_p9, %p2715_p10  ;;  %p2175_p13 = por %p2174_p1, %p2173_p5 }
  0x88   : > { %p2171_p4 = pneg %p2170_p3  ;;  %p2177_p7 = por %p2176_p6, %p2175_p13 }
  0x8a   : > { %p2178_p2 = pnand %p2177_p7, %p2171_p4 }
  0x8c   : > { %2181 = shalt.err (!%p2178_p2)
}
  0x8d   : > { %s2182_s23 = scalar_lea.vmem %s390_s22, 16  ;;  %s2482_s27 = smov [#allocation10]  }
  0x8e   : > { %p2183_p8 = scmp.ne.s32.totalorder %s390_s22, %s2182_s23  ;;  %s2187_s29 = sshll.u32 %s2482_s27, 4  ;;  %s2188_s29 = int_to_ptr.vmem [resolvable:$false] %s2187_s29 }
  0x8f   : > { %s2189_s11 = scalar_lea.vmem %s2188_s29, 32  ;;  %p2190_p9 = scmp.lt.s32.totalorder %s390_s22, %s2188_s29 }
  0x90   : > { %p2185_p12 = pnand %p2183_p8, %p2715_p10  ;;  %p2191_p3 = scmp.lt.s32.totalorder %s2189_s11, %s2182_s23 }
  0x92   : > { %p2186_p0 = pneg %p2185_p12  ;;  %p2192_p11 = por %p2191_p3, %p2190_p9 }
  0x94   : > { %p2193_p1 = pnand %p2192_p11, %p2186_p0 }
  0x96   : > { %2196 = shalt.err (!%p2193_p1)
}
  0x97   : > { %p3299_p5 = scmp.ne.s32.totalorder %s3294_s1, 0  ;;  %s2800_s18 = scalar_lea.hbm %s3249_s5, %s2740_s0 }
  0x98   : > { %s400_s20 = scalar_lea.vmem [#allocation11], %s2709_s28  ;;  %s2809_s27 = scalar_lea.hbm %s3250_s6, %s2740_s0 }
  0x99   : > { %1915 = dma.hbm_to_vmem [thread:$0]  (!%p3299_p5), %s387_s3, 16, %s390_s22, %s2671_s16  }
  0x9a   : > { %s407_s9 = sshll.u32 %s400_s20, 4  ;;  %s2197_s29 = scalar_lea.hbm %s2800_s18, 256  ;;  %s2803_s9 = int_to_ptr.vmem [resolvable:$true] %s407_s9 }
  0x9b   : > { %p2198_p11 = scmp.ne.s32.totalorder %s2800_s18, %s2197_s29  ;;  %s2202_s11 = scalar_lea.hbm %s3249_s5, 512 }
  0x9c   : > { %p2203_p6 = scmp.lt.u32.totalorder %s2800_s18, %s3249_s5  ;;  %p2204_p7 = scmp.lt.u32.totalorder %s2202_s11, %s2197_s29 }
  0x9d   : > { %p2200_p4 = pnand %p2198_p11, %p2715_p10  ;;  %p2206_p8 = scmp.lt.u32.totalorder %s2197_s29, %s2800_s18 }
  0x9e   : > { %p2205_p2 = por %p2204_p7, %p2203_p6 }
  0x9f   : > { %p2201_p13 = pneg %p2200_p4 }
  0xa0   : > { %p2207_p12 = por %p2206_p8, %p2205_p2 }
  0xa2   : > { %p2208_p0 = pnand %p2207_p12, %p2201_p13 }
  0xa4   : > { %2211 = shalt.err (!%p2208_p0)
}
  0xa5   : > { %s2212_s0 = scalar_lea.vmem %s2803_s9, 256  ;;  %s2483_s20 = smov [#allocation11]  }
  0xa6   : > { %p2213_p9 = scmp.ne.s32.totalorder %s2803_s9, %s2212_s0  ;;  %s2217_s25 = sshll.u32 %s2483_s20, 4  ;;  %s2218_s25 = int_to_ptr.vmem [resolvable:$false] %s2217_s25 }
  0xa7   : > { %s2219_s23 = scalar_lea.vmem %s2218_s25, 512  ;;  %p2220_p11 = scmp.lt.s32.totalorder %s2803_s9, %s2218_s25 }
  0xa8   : > { %p2215_p3 = pnand %p2213_p9, %p2715_p10  ;;  %p2221_p4 = scmp.lt.s32.totalorder %s2219_s23, %s2212_s0 }
  0xaa   : > { %p2216_p1 = pneg %p2215_p3  ;;  %p2222_p6 = por %p2221_p4, %p2220_p11 }
  0xac   : > { %p2223_p7 = pnand %p2222_p6, %p2216_p1 }
  0xae   : > { %2226 = shalt.err (!%p2223_p7)
}
  0xaf   : > { %1918 = dma.hbm_to_vmem [thread:$0]  (!%p3299_p5), %s2800_s18, 256, %s2803_s9, %s2671_s16, %s3267_s2, %s3267_s2, %s3268_s24  }
  0xb0   : > { %s421_s29 = scalar_lea.vmem [#allocation12], %s2709_s28  ;;  %s2844_s8 = scalar_lea.hbm %s3251_s7, %s1709_s21 }
  0xb1   : > { %s428_s3 = sshll.u32 %s421_s29, 4  ;;  %s2227_s14 = scalar_lea.hbm %s2809_s27, 256  ;;  %s2837_s3 = int_to_ptr.vmem [resolvable:$true] %s428_s3 }
  0xb2   : > { %p2228_p13 = scmp.ne.s32.totalorder %s2809_s27, %s2227_s14  ;;  %s2232_s25 = scalar_lea.hbm %s3250_s6, 512 }
  0xb3   : > { %p2233_p12 = scmp.lt.u32.totalorder %s2809_s27, %s3250_s6  ;;  %p2234_p0 = scmp.lt.u32.totalorder %s2232_s25, %s2227_s14 }
  0xb4   : > { %p2230_p2 = pnand %p2228_p13, %p2715_p10  ;;  %p2236_p3 = scmp.lt.u32.totalorder %s2227_s14, %s2809_s27 }
  0xb5   : > { %p2235_p9 = por %p2234_p0, %p2233_p12 }
  0xb6   : > { %p2231_p8 = pneg %p2230_p2 }
  0xb7   : > { %p2237_p1 = por %p2236_p3, %p2235_p9 }
  0xb9   : > { %p2238_p11 = pnand %p2237_p1, %p2231_p8 }
  0xbb   : > { %2241 = shalt.err (!%p2238_p11)
}
  0xbc   : > { %s2242_s21 = scalar_lea.vmem %s2837_s3, 256  ;;  %s2484_s9 = smov [#allocation12]  }
  0xbd   : > { %p2243_p4 = scmp.ne.s32.totalorder %s2837_s3, %s2242_s21  ;;  %s2247_s23 = sshll.u32 %s2484_s9, 4  ;;  %s2248_s23 = int_to_ptr.vmem [resolvable:$false] %s2247_s23 }
  0xbe   : > { %s2249_s29 = scalar_lea.vmem %s2248_s23, 512  ;;  %p2250_p13 = scmp.lt.s32.totalorder %s2837_s3, %s2248_s23 }
  0xbf   : > { %p2245_p6 = pnand %p2243_p4, %p2715_p10  ;;  %p2251_p2 = scmp.lt.s32.totalorder %s2249_s29, %s2242_s21 }
  0xc1   : > { %p2246_p7 = pneg %p2245_p6  ;;  %p2252_p12 = por %p2251_p2, %p2250_p13 }
  0xc3   : > { %p2253_p0 = pnand %p2252_p12, %p2246_p7 }
  0xc5   : > { %2256 = shalt.err (!%p2253_p0)
}
  0xc6   : > { %1921 = dma.hbm_to_vmem [thread:$0]  (!%p3299_p5), %s2809_s27, 256, %s2837_s3, %s2671_s16, %s3267_s2, %s3267_s2, %s3268_s24  }
  0xc7   : > { %s441_s22 = scalar_lea.vmem [#allocation13], %s2669_s15  ;;  %s2257_s14 = scalar_lea.hbm %s2844_s8, 16 }
  0xc8   : > { %s448_s11 = sshll.u32 %s441_s22, 4  ;;  %p2258_p8 = scmp.ne.s32.totalorder %s2844_s8, %s2257_s14  ;;  %s449_s11 = int_to_ptr.vmem [resolvable:$true] %s448_s11 }
  0xc9   : > { %s2262_s25 = scalar_lea.hbm %s3251_s7, 32  ;;  %p2263_p1 = scmp.lt.u32.totalorder %s2844_s8, %s3251_s7 }
  0xca   : > { %p2260_p9 = pnand %p2258_p8, %p2715_p10  ;;  %p2264_p11 = scmp.lt.u32.totalorder %s2262_s25, %s2257_s14 }
  0xcb   : > { %p2266_p6 = scmp.lt.u32.totalorder %s2257_s14, %s2844_s8 }
  0xcc   : > { %p2261_p3 = pneg %p2260_p9  ;;  %p2265_p4 = por %p2264_p11, %p2263_p1 }
  0xce   : > { %p2267_p7 = por %p2266_p6, %p2265_p4 }
  0xd0   : > { %p2268_p13 = pnand %p2267_p7, %p2261_p3 }
  0xd2   : > { %2271 = shalt.err (!%p2268_p13)
}
  0xd3   : > { %s2272_s27 = scalar_lea.vmem %s449_s11, 16  ;;  %s2485_s3 = smov [#allocation13]  }
  0xd4   : > { %p2273_p2 = scmp.ne.s32.totalorder %s449_s11, %s2272_s27  ;;  %s2277_s21 = sshll.u32 %s2485_s3, 4  ;;  %s2278_s21 = int_to_ptr.vmem [resolvable:$false] %s2277_s21 }
  0xd5   : > { %s2279_s9 = scalar_lea.vmem %s2278_s21, 32  ;;  %p2280_p8 = scmp.lt.s32.totalorder %s449_s11, %s2278_s21 }
  0xd6   : > { %p2275_p12 = pnand %p2273_p2, %p2715_p10  ;;  %p2281_p9 = scmp.lt.s32.totalorder %s2279_s9, %s2272_s27 }
  0xd8   : > { %p2276_p0 = pneg %p2275_p12  ;;  %p2282_p5 = por %p2281_p9, %p2280_p8 }
  0xda   : > { %p2283_p1 = pnand %p2282_p5, %p2276_p0 }
  0xdc   : > { %2286 = shalt.err (!%p2283_p1)
}
  0xdd   : > { %p3300_p11 = scmp.ne.s32.totalorder %s3294_s1, 0  ;;  %s3301_s23 = sld [smem:[#allocation21_spill]] }
  0xde   : > { %s2891_s29 = sadd.s32 4294967295, %s2475_s19   ;;  %s1698_s22 = sadd.s32 4294967294, %s2475_s19  }
  0xdf   : > { %1924 = dma.hbm_to_vmem [thread:$0]  (!%p3300_p11), %s2844_s8, 16, %s449_s11, %s2671_s16  }
  0xe0   : > { %p58_p5 = scmp.ne.s32.totalorder %s2451_s13, %s2447_s12  ;;  %p3269_p3 = scmp.eq.s32.totalorder %s2891_s29, 0 }
  0xe1   : > { %p105_p4 = scmp.ne.s32.totalorder %s2439_s10, %s2435_s30  ;;  %p285_p6 = scmp.eq.s32.totalorder %s2891_s29, 3 }
  0xe2   : > { %p2902_p7 = por %p3269_p3, %p58_p5  ;;  %p291_p13 = scmp.eq.s32.totalorder %s1698_s22, 3 }
  0xe3   : > { %p2908_p2 = por %p105_p4, %p3269_p3  ;;  %p3304_p12 = scmp.ne.s32.totalorder %s3301_s23, %s2451_s13 }
  0xe4   : > { %s3302_s14 = scalar_select %p2902_p7, 1, 0 }
  0xe5   : > { %s3303_s8 = scalar_select %p2908_p2, 1, 0 }
  0xe6   : > { %p2915_p0 = por %p285_p6, %p3304_p12  ;;  %p2919_p8 = por %p291_p13, %p58_p5 }
  0xe7   : > { %p1699_p9 = scmp.ge.s32.totalorder %s2475_s19, 1  ;;  %p298_p1 = scmp.lt.s32.totalorder %s2475_s19, 5 }
  0xe8   : > { %s3305_s11 = scalar_select %p2915_p0, 1, 0 }
  0xe9   : > { %s3306_s30 = scalar_select %p2919_p8, 1, 0 }
  0xea   : > { %s1717_s0 = sshll.u32 %s2669_s15, 5  ;;  %p2926_p7 = pnand %p1699_p9, %p298_p1 }
  0xeb   : > { %s2486_s25 = smov [#allocation6]   ;;  %s1762_s28 = sshll.u32 %s2467_s17, 9 }
  0xec   : > { %s3307_s20 = scalar_select %p2926_p7, 1, 0 }
  0xed   : > { %s311_s18 = sshll.u32 %s2486_s25, 4  ;;  %p1899_p4 = pneg %p2926_p7  ;;  %s2930_s18 = int_to_ptr.vmem [resolvable:$true] %s311_s18 }
  0xee   : > { %s3308_s21 = sld [smem:[#allocation34_spill]]  ;;  %s459_s15 = scalar_lea.vmem [#allocation14], %s1717_s0 }
  0xef   : > { %s466_s23 = sshll.u32 %s459_s15, 4  ;;  %p2942_p5 = pnand %p1899_p4, %p3269_p3  ;;  %s2946_s23 = int_to_ptr.vmem [resolvable:$true] %s466_s23 }
  0xf1   : > { %s3309_s22 = scalar_select %p2942_p5, 1, 0 }
  0xf4   : > { %s2938_s9 = scalar_lea.hbm %s3308_s21, %s1762_s28  ;;  %s2292_s3 = scalar_lea.hbm %s3308_s21, 1024 }
  0xf5   : > { %s2287_s25 = scalar_lea.hbm %s2938_s9, 512  ;;  %p2293_p9 = scmp.lt.u32.totalorder %s2938_s9, %s3308_s21 }
  0xf6   : > { %p2288_p6 = scmp.ne.s32.totalorder %s2938_s9, %s2287_s25  ;;  %p2294_p1 = scmp.lt.u32.totalorder %s2292_s3, %s2287_s25 }
  0xf7   : > { %p2296_p3 = scmp.lt.u32.totalorder %s2287_s25, %s2938_s9 }
  0xf8   : > { %p2290_p13 = pnand %p2288_p6, %p2715_p10  ;;  %p2295_p4 = por %p2294_p1, %p2293_p9 }
  0xfa   : > { %p2291_p12 = pneg %p2290_p13  ;;  %p2297_p8 = por %p2296_p3, %p2295_p4 }
  0xfc   : > { %p2298_p0 = pnand %p2297_p8, %p2291_p12 }
  0xfe   : > { %2301 = shalt.err (!%p2298_p0)
}
  0xff   : > { %s2302_s0 = scalar_lea.vmem %s2946_s23, 512  ;;  %s2487_s15 = smov [#allocation14]  }
 0x100   : > { %p2303_p6 = scmp.ne.s32.totalorder %s2946_s23, %s2302_s0  ;;  %s2307_s28 = sshll.u32 %s2487_s15, 4  ;;  %s2308_s28 = int_to_ptr.vmem [resolvable:$false] %s2307_s28 }
 0x101   : > { %s2309_s2 = scalar_lea.vmem %s2308_s28, 1024  ;;  %p2310_p7 = scmp.lt.s32.totalorder %s2946_s23, %s2308_s28 }
 0x102   : > { %p2305_p13 = pnand %p2303_p6, %p2715_p10  ;;  %p2311_p5 = scmp.lt.s32.totalorder %s2309_s2, %s2302_s0 }
 0x104   : > { %p2306_p2 = pneg %p2305_p13  ;;  %p2312_p9 = por %p2311_p5, %p2310_p7 }
 0x106   : > { %p2313_p1 = pnand %p2312_p9, %p2306_p2 }
 0x108   : > { %2316 = shalt.err (!%p2313_p1)
}
 0x109   : > { %s3310_s24 = smov 4   ;;  %s3311_s25 = smov 64  }
 0x10a   : > { %1927 = dma.hbm_to_vmem [thread:$0]  (!%p3300_p11), %s2938_s9, 512, %s2946_s23, %s2671_s16, %s3311_s25, %s3311_s25, %s3310_s24  }
 0x10b   : > { %s3312_s3 = sld [smem:[#allocation30_spill]]  ;;  %p3313_p3 = scmp.ne.s32.totalorder %s3309_s22, 0 }
 0x10d   : > { %p2319_p7 = pneg %p3313_p3 }
 0x111   : > { %s2317_s15 = scalar_lea.hbm %s3312_s3, 128 }
 0x112   : > { %p2318_p10 = scmp.ne.s32.totalorder %s3312_s3, %s2317_s15  ;;  %p2324_p8 = scmp.lt.u32.totalorder %s2317_s15, %s3312_s3 }
 0x114   : > { %p2320_p2 = pnand %p2319_p7, %p2318_p10 }
 0x116   : > { %p2321_p0 = pneg %p2320_p2 }
 0x118   : > { %p2326_p5 = pnand %p2324_p8, %p2321_p0 }
 0x11a   : > { %2329 = shalt.err (!%p2326_p5)
}
 0x11b   : > { %s2330_s16 = scalar_lea.vmem %s2930_s18, 128  ;;  %p2338_p6 = scmp.lt.s32.totalorder %s2930_s18, %s2930_s18 }
 0x11c   : > { %p2331_p11 = scmp.ne.s32.totalorder %s2930_s18, %s2330_s16  ;;  %p2339_p13 = scmp.lt.s32.totalorder %s2330_s16, %s2330_s16 }
 0x11e   : > { %p2333_p12 = pnand %p2331_p11, %p2319_p7  ;;  %p2340_p9 = por %p2339_p13, %p2338_p6 }
 0x120   : > { %p2334_p4 = pneg %p2333_p12 }
 0x122   : > { %p2341_p1 = pnand %p2340_p9, %p2334_p4 }
 0x124   : > { %2344 = shalt.err (!%p2341_p1)
}
 0x125   : > { %1902 = dma.hbm_to_vmem [thread:$0]  (!%p3313_p3), %s3312_s3, 128, %s2930_s18, [#allocation7]  }
 0x126   : > { %p3314_p10 = scmp.ne.s32.totalorder %s3307_s20, 0 }
 0x127   : > { %s480_s23 = sand.u32 (!%p3314_p10), 1, %s2891_s29   ;;  %s482_s2 = sand.u32 (!%p3314_p10), 1, %s2451_s13  }
 0x128   : > { %478 = sbr.rel (%p3314_p10) target bundleno = 3235 (0xca3), region = 56  ;;  %s3000_s24 = sshll.u32 (!%p3314_p10), %s482_s2, 3 }
 0x129   : > { %s481_s25 = scalar_lea.sflag (!%p3314_p10), [#allocation4], %s480_s23  ;;  %s484_s22 = scalar_lea.vmem (!%p3314_p10), [#allocation3], %s3000_s24 }
 0x12a   : > { %p3315_p7 = scmp.ne.s32.totalorder (!%p3314_p10), %s3302_s14, 0 }
 0x12f   : > { %2418 = dma.done.wait (%p3315_p7), %s481_s25, 128  }
 0x130   : > { %2420 = vsyncadd (%p3315_p7), %s481_s25, 4294967168  ;;  %p3316_p3 = scmp.eq.s32.totalorder %s2891_s29, 0 }
 0x132   : > { %2422 = dma.done.wait (%p3316_p3), [#allocation7], 128   ;;  %p3317_p2 = pmov %p3316_p3 }
 0x133   : > { %s3012_s20 = sand.u32 1, %s2439_s10   ;;  %p3318_p0 = scmp.ne.s32.totalorder %s3303_s8, 0 }
 0x134   : > { %2424 = vsyncadd (%p3317_p2), [#allocation7], 4294967168  ;;  %s1723_s18 = sshll.u32 %s3012_s20, 3 }
 0x135   : > { %s3015_s26 = scalar_lea.vmem [#allocation8], %s1723_s18 }
 0x136   : > { %2426 = dma.done.wait (%p3318_p0), %s481_s25, 1440  }
 0x137   : > { %2428 = vsyncadd (%p3318_p0), %s481_s25, 4294965856  ;;  %s3022_s29 = sshll.u32 %s3012_s20, 4  ;;  %s1727_s14 = sshll.u32 %s3012_s20, 5 }
 0x138   : > { %s506_s27 = scalar_lea.vmem [#allocation9], %s3022_s29  ;;  %s514_s15 = scalar_lea.vmem [#allocation10], %s3012_s20 }
 0x139   : > { %s523_s28 = scalar_lea.vmem [#allocation11], %s3022_s29  ;;  %s532_s1 = scalar_lea.vmem [#allocation12], %s3022_s29 }
 0x13a   : > { %s540_s0 = scalar_lea.vmem [#allocation13], %s3012_s20  ;;  %s3030_s16 = scalar_lea.vmem [#allocation14], %s1727_s14 }
 0x13b   : > { %s616_s8 = scalar_lea.vmem [#allocation15], %s3000_s24  ;;  %s3319_s4 = sld [smem:[#allocation22_spill]] }
 0x141   : > { %p1729_p8 = scmp.ne.s32.totalorder %s3319_s4, 0 }
 0x142   : > { %v622_v0 = vld [vmem:[%s484_s22] sm:$0xff] (!%p1729_p8)  ;;  %v623_v1 = vld [vmem:[#allocation6] sm:$0xff] (!%p1729_p8)  ;;  %vm625_vm0 = vcmask (!%p1729_p8), 261120  }
 0x143   : > { %621 = sbr.rel (%p1729_p8) target bundleno = 330 (0x14a), region = 96  ;;  %v624_v2 = vadd.f32 (!%p1729_p8), %v623_v1, %v622_v0 }
 0x145   : > { %626 = vst.msk [vmem:[#allocation2] sm:$0xff] (!%p1729_p8), %vm625_vm0, %v624_v2 }
 0x14a PF: > { %vm629_vm1 = vcmask 261120   ;;  %v2043_v10 = vld [vmem:[%s506_s27] sm:$0xff]   ;;  %v2488_v11 = vmov 0.0   ;;  %vm2489_vm2 = vmmov 0   ;;  %v2044_v12 = vld [vmem:[%s506_s27 + $0x8] sm:$0xff]   ;;  %v644_v15 = vlaneseq  ;;  %s2490_s9 = smov 120  }
 0x14b   : > { %1793 = vmatprep.subr.bf16.mxu0 %v2488_v11  ;;  %1797 = vmatprep.mubr.msk.bf16.mxu0 %vm2489_vm2, %v2488_v11  ;;  %v3056_v19 = vld [vmem:[%s3015_s26] sm:$0xff]  ;;  %s2491_s23 = smov 96   ;;  %s2492_s25 = smov 88   ;;  %vm725_vm3 = vcmask 64512   ;;  %vm789_vm4 = vcmask 1043456   ;;  %vm1179_vm5 = vcmask 130048  }
 0x14c   : > { %v3034_v3 = vld [vmem:[#allocation2] sm:$0xff]  ;;  %1794 = vmatpush3.bf16.msra.mxu0 %v2043_v10  ;;  %1801 = vmatprep.subr.bf16.mxu1 %v2488_v11  ;;  %v3052_v17 = vshrl.u32 %v644_v15, 7  ;;  %s2493_s22 = smov 80   ;;  %s2494_s18 = smov 112   ;;  %vm1182_vm6 = vcmask 195584   ;;  %vm1384_vm7 = vcmask 523264  }
 0x14d   : > { %v630_v4 = vsel %vm629_vm1, %v3034_v3, 0.0  ;;  %1795 = vmatprep.subr.bf16.mxu0 %v2488_v11  ;;  %1803 = vmatprep.mubr.msk.bf16.mxu1 %vm2489_vm2, %v2488_v11  ;;  %v1730_v28 = vld [vmem:[%s514_s15] ss:$0 sm:$0xff]  ;;  %s2495_s26 = smov 72   ;;  %s2496_s14 = smov 104  }
 0x14e   : > { %631 = vadd.xlane.f32.xlu0 %v630_v4  ;;  %v646_v18 = vsub.s32 0, %v3052_v17  ;;  %v651_v20 = vsub.s32 1, %v3052_v17  ;;  %s2497_s27 = smov 64   ;;  %s2498_s15 = smov 56  }
 0x14f   : > { %s2499_s4 = smov 48   ;;  %s3320_s20 = sld [smem:[#allocation22_spill]] }
 0x150   : > { %1796 = vmatpush3.bf16.msra.mxu0 %v2044_v12  ;;  %v647_v21 = vrot.slane %v3056_v19, %v646_v18  ;;  %v652_v24 = vrot.slane %v3056_v19, %v651_v20 }
 0x151   : > { %1807 = vmatprep.subr.bf16.mxu0 %v2488_v11 }
 0x155   : > { %p1754_p5 = scmp.ne.s32.totalorder %s3320_s20, 1 }
 0x1db   : > { %v632_v5 = vpop.xlane.xlu0 %631 }
 0x1dc   : > { %v634_v6 = vmul.f32 0.03125, %v632_v5 }
 0x1de   : > { %v635_v7 = vsub.f32 %v3034_v3, %v634_v6 }
 0x1e0   : > { %v636_v8 = vmul.f32 %v635_v7, %v635_v7 }
 0x1e2   : > { %v637_v9 = vsel %vm629_vm1, %v636_v8, 0.0 }
 0x1e3   : > { %638 = vadd.xlane.f32.xlu0 %v637_v9 }
 0x270   : > { %v639_v13 = vpop.xlane.xlu0 %638 }
 0x271   : > { %v640_v14 = vmul.f32 0.03125, %v639_v13 }
 0x273   : > { %v641_v16 = vadd.f32 1e-06, %v640_v14 }
 0x275   : > { %2053 = vrsqrt.f32 %v641_v16 }
 0x27f   : > { %v2054_v22 = vpop.eup %2053 }
 0x280   : > { %v643_v23 = vmul.f32 %v2054_v22, %v635_v7 }
 0x282   : > { %v648_v25 = vmul.f32 %v647_v21, %v643_v23 }
 0x284   : > { %v653_v26 = vadd.f32 %v652_v24, %v648_v25 }
 0x286   : > { %v654_v27 = vpack.c.bf16 %v653_v26, %v653_v26 }
 0x288   : > { %1798 = vmatmul.mubr.msk.bf16.vlgmr.msra.gmra.mrb[0].mxu0 %vm629_vm1, %v654_v27 }
 0x289   : > { %1809 = vmatprep.mubr.msk.bf16.mxu0 %vm2489_vm2, %v2488_v11 }
 0x35b   : > { %v715_v29 = vpop.f32.mrb[0].mxu0 }
 0x35c   : > { %v716_v30 = vadd.f32 %v1730_v28, %v715_v29  ;;  %v1799_v31 = vpop.f32.mrb[1].mxu0 }
 0x35d   : > { %v718_v32 = vpop.f32.mrb[2].mxu0 }
 0x35e   : > { %v3066_v33 = vpack.c.bf16 %v716_v30, %v716_v30  ;;  %v1800_v34 = vpop.f32.mrb[3].mxu0 }
 0x360   : > { %834 = vrot.lane.b32.xlu0 %v3066_v33, %s2490_s9  ;;  %723 = vrot.lane.b32.xlu1 %v3066_v33, %s2491_s23  ;;  %s2500_s9 = smov 40   ;;  %s2501_s23 = smov 8  }
 0x364   : > { %836 = vrot.lane.b32.xlu1 %v3066_v33, %s2492_s25  ;;  %s2502_s25 = smov 16  }
 0x368   : > { %947 = vrot.lane.b32.xlu1 %v3066_v33, %s2493_s22  ;;  %s2503_s22 = smov 24  }
 0x36c   : > { %945 = vrot.lane.b32.xlu1 %v3066_v33, %s2494_s18 }
 0x370   : > { %1058 = vrot.lane.b32.xlu1 %v3066_v33, %s2495_s26 }
 0x374   : > { %1056 = vrot.lane.b32.xlu1 %v3066_v33, %s2496_s14 }
 0x3d2   : > { %v724_v35 = vpop.permute.xlu1 %723  ;;  %v835_v40 = vpop.permute.xlu0 %834 }
 0x3d3   : > { %v730_v36 = vsel %vm725_vm3, %v724_v35, 0 }
 0x3d4   : > { %1802 = vmatpush3.bf16.xpose.msra.mxu1 %v730_v36 }
 0x3d5   : > { %1813 = vmatprep.subr.bf16.mxu1 %v2488_v11 }
 0x3d6   : > { %v837_v37 = vpop.permute.xlu1 %836 }
 0x3d7   : > { %v842_v38 = vsel %vm725_vm3, %v837_v37, 0 }
 0x3da   : > { %v948_v39 = vpop.permute.xlu1 %947 }
 0x3db   : > { %1804 = vmatmul.mubr.msk.bf16.vlgmr.msra.gmra.mrb[0].mxu1 %vm725_vm3, %v3066_v33  ;;  %v953_v42 = vsel %vm725_vm3, %v948_v39, 0 }
 0x3dc   : > { %1814 = vmatpush3.bf16.xpose.msra.mxu1 %v842_v38  ;;  %1815 = vmatprep.mubr.msk.bf16.mxu1 %vm2489_vm2, %v2488_v11 }
 0x3dd   : > { %1825 = vmatprep.subr.bf16.mxu1 %v2488_v11 }
 0x3de   : > { %v946_v41 = vpop.permute.xlu1 %945 }
 0x3e2   : > { %v1059_v43 = vpop.permute.xlu1 %1058 }
 0x3e3   : > { %1816 = vmatmul.mubr.msk.bf16.vlgmr.msra.gmra.mrb[4].mxu1 %vm725_vm3, %v835_v40  ;;  %v1064_v44 = vsel %vm725_vm3, %v1059_v43, 0 }
 0x3e4   : > { %1826 = vmatpush3.bf16.xpose.msra.mxu1 %v953_v42  ;;  %1827 = vmatprep.mubr.msk.bf16.mxu1 %vm2489_vm2, %v2488_v11 }
 0x3e5   : > { %1837 = vmatprep.subr.bf16.mxu1 %v2488_v11 }
 0x3e6   : > { %v1057_v45 = vpop.permute.xlu1 %1056 }
 0x3eb   : > { %1828 = vmatmul.mubr.msk.bf16.vlgmr.msra.gmra.mrb[8].mxu1 %vm725_vm3, %v946_v41 }
 0x3ec   : > { %1838 = vmatpush3.bf16.xpose.msra.mxu1 %v1064_v44  ;;  %1839 = vmatprep.mubr.msk.bf16.mxu1 %vm2489_vm2, %v2488_v11 }
 0x3ed   : > { %1849 = vmatprep.subr.bf16.mxu1 %v2488_v11 }
 0x3f3   : > { %1840 = vmatmul.mubr.msk.bf16.vlgmr.msra.gmra.mrb[12].mxu1 %vm725_vm3, %v1057_v45 }
 0x3f4   : > { %1853 = vmatprep.mubr.msk.bf16.mxu1 %vm2489_vm2, %v2488_v11 }
 0x4ae   : > { %v766_v46 = vpop.f32.mrb[0].mxu1 }
 0x4af   : > { %v1805_v47 = vpop.f32.mrb[1].mxu1  ;;  %v772_v48 = vsel %vm725_vm3, %v766_v46, -inf }
 0x4b0   : > { %773 = vmax.xlane.f32.xlu1 %v772_v48  ;;  %v769_v49 = vpop.f32.mrb[2].mxu1 }
 0x4b1   : > { %v1806_v50 = vpop.f32.mrb[3].mxu1 }
 0x4b6   : > { %v878_v51 = vpop.f32.mrb[4].mxu1 }
 0x4b7   : > { %v1817_v52 = vpop.f32.mrb[5].mxu1  ;;  %v884_v53 = vsel %vm725_vm3, %v878_v51, -inf }
 0x4b8   : > { %885 = vmax.xlane.f32.xlu0 %v884_v53  ;;  %v881_v54 = vpop.f32.mrb[6].mxu1 }
 0x4b9   : > { %v1818_v55 = vpop.f32.mrb[7].mxu1 }
 0x4be   : > { %v989_v56 = vpop.f32.mrb[8].mxu1 }
 0x4bf   : > { %v1829_v57 = vpop.f32.mrb[9].mxu1  ;;  %v995_v58 = vsel %vm725_vm3, %v989_v56, -inf }
 0x4c0   : > { %996 = vmax.xlane.f32.xlu1 %v995_v58  ;;  %v992_v59 = vpop.f32.mrb[10].mxu1 }
 0x4c1   : > { %v1830_v60 = vpop.f32.mrb[11].mxu1  ;;  %v2045_v59 = vld [vmem:[%s523_s28] sm:$0xff]  }
 0x4c2   : > { %1850 = vmatpush3.bf16.msra.mxu1 %v2045_v59  ;;  %v2046_v60 = vld [vmem:[%s523_s28 + $0x8] sm:$0xff]  }
 0x4c3   : > { %1851 = vmatprep.subr.bf16.mxu1 %v2488_v11 }
 0x4c6   : > { %v1100_v61 = vpop.f32.mrb[12].mxu1  ;;  %1852 = vmatpush3.bf16.msra.mxu1 %v2046_v60 }
 0x4c7   : > { %v1841_v62 = vpop.f32.mrb[13].mxu1  ;;  %v1106_v63 = vsel %vm725_vm3, %v1100_v61, -inf  ;;  %1865 = vmatprep.subr.bf16.mxu1 %v2488_v11 }
 0x4c8   : > { %1107 = vmax.xlane.f32.xlu0 %v1106_v63  ;;  %v1103_v0 = vpop.f32.mrb[14].mxu1 }
 0x4c9   : > { %v1842_v1 = vpop.f32.mrb[15].mxu1 }
 0x53d   : > { %v774_v2 = vpop.xlane.xlu1 %773 }
 0x53e   : > { %v775_v4 = vsub.f32 %v766_v46, %v774_v2 }
 0x540   : > { %v776_v5 = vmul.f32 1.442695, %v775_v4 }
 0x542   : > { %2055 = vpow2.f32 %v776_v5 }
 0x545   : > { %v886_v6 = vpop.xlane.xlu0 %885 }
 0x546   : > { %v887_v7 = vsub.f32 %v878_v51, %v886_v6 }
 0x548   : > { %v888_v8 = vmul.f32 1.442695, %v887_v7 }
 0x54a   : > { %2057 = vpow2.f32 %v888_v8 }
 0x54c   : > { %v2056_v9 = vpop.eup %2055 }
 0x54d   : > { %v778_v10 = vsel %vm725_vm3, %v2056_v9, 0.0  ;;  %v997_v21 = vpop.xlane.xlu1 %996 }
 0x54e   : > { %779 = vadd.xlane.f32.xlu1 %v778_v10  ;;  %v998_v22 = vsub.f32 %v989_v56, %v997_v21 }
 0x550   : > { %v999_v23 = vmul.f32 1.442695, %v998_v22 }
 0x554   : > { %v2058_v12 = vpop.eup %2057 }
 0x555   : > { %v1108_v13 = vpop.xlane.xlu0 %1107  ;;  %v890_v14 = vsel %vm725_vm3, %v2058_v12, 0.0 }
 0x556   : > { %v1109_v15 = vsub.f32 %v1100_v61, %v1108_v13  ;;  %891 = vadd.xlane.f32.xlu0 %v890_v14 }
 0x558   : > { %v1110_v16 = vmul.f32 1.442695, %v1109_v15 }
 0x55a   : > { %2059 = vpow2.f32 %v1110_v16  ;;  %v1191_v16 = vsub.s32 4, %v3052_v17 }
 0x55b   : > { %2061 = vpow2.f32 %v999_v23 }
 0x55f   : > { %784 = vrot.lane.b32.xlu1 %v3066_v33, %s2497_s27 }
 0x564   : > { %v2060_v18 = vpop.eup %2059 }
 0x565   : > { %v1112_v20 = vsel %vm725_vm3, %v2060_v18, 0.0  ;;  %v2062_v24 = vpop.eup %2061 }
 0x566   : > { %1113 = vadd.xlane.f32.xlu0 %v1112_v20  ;;  %v1001_v25 = vsel %vm725_vm3, %v2062_v24, 0.0 }
 0x57c   : > { %896 = vrot.lane.b32.xlu0 %v3066_v33, %s2498_s15 }
 0x583   : > { %1002 = vadd.xlane.f32.xlu1 %v1001_v25 }
 0x594   : > { %1007 = vrot.lane.b32.xlu1 %v3066_v33, %s2499_s4 }
 0x598   : > { %1118 = vrot.lane.b32.xlu1 %v3066_v33, %s2500_s9 }
 0x5db   : > { %v780_v26 = vpop.xlane.xlu1 %779 }
 0x5dc   : > { %2063 = vrcp.f32 %v780_v26 }
 0x5df   : > { %v785_v27 = vpop.permute.xlu1 %784 }
 0x5e0   : > { %v791_v28 = vsel %vm789_vm4, %v785_v27, 0 }
 0x5e1   : > { %1808 = vmatpush3.bf16.msra.mxu0 %v791_v28 }
 0x5e2   : > { %1819 = vmatprep.subr.bf16.mxu0 %v2488_v11 }
 0x5e3   : > { %v892_v30 = vpop.xlane.xlu0 %891 }
 0x5e4   : > { %2065 = vrcp.f32 %v892_v30 }
 0x5e6   : > { %v2064_v29 = vpop.eup %2063 }
 0x5e7   : > { %v782_v31 = vmul.f32 %v2064_v29, %v2056_v9 }
 0x5e9   : > { %v783_v32 = vpack.c.bf16 %v782_v31, %v782_v31 }
 0x5eb   : > { %1810 = vmatmul.mubr.msk.bf16.vlgmr.msra.gmra.mrb[4].mxu0 %vm725_vm3, %v783_v32  ;;  %v2047_v32 = vld [vmem:[%s532_s1] sm:$0xff]  }
 0x5ec   : > { %1821 = vmatprep.mubr.msk.bf16.mxu0 %vm2489_vm2, %v2488_v11 }
 0x5ee   : > { %v2066_v33 = vpop.eup %2065 }
 0x5ef   : > { %v894_v35 = vmul.f32 %v2066_v33, %v2058_v12  ;;  %v2048_v33 = vld [vmem:[%s532_s1 + $0x8] sm:$0xff]  }
 0x5f1   : > { %v895_v38 = vpack.c.bf16 %v894_v35, %v894_v35 }
 0x5f3   : > { %v1114_v34 = vpop.xlane.xlu0 %1113 }
 0x5f7   : > { %v897_v36 = vpop.permute.xlu0 %896 }
 0x5f8   : > { %v902_v37 = vsel %vm789_vm4, %v897_v36, 0  ;;  %v1263_v36 = vsub.s32 2, %v3052_v17 }
 0x5f9   : > { %1820 = vmatpush3.bf16.msra.mxu0 %v902_v37  ;;  %v1268_v37 = vsub.s32 3, %v3052_v17 }
 0x5fa   : > { %1831 = vmatprep.subr.bf16.mxu0 %v2488_v11 }
 0x5fc   : > { %1822 = vmatmul.mubr.msk.bf16.vlgmr.msra.gmra.mrb[8].mxu0 %vm725_vm3, %v895_v38  ;;  %v1264_v38 = vrot.slane %v3056_v19, %v1263_v36 }
 0x5fd   : > { %1833 = vmatprep.mubr.msk.bf16.mxu0 %vm2489_vm2, %v2488_v11 }
 0x610   : > { %v1003_v39 = vpop.xlane.xlu1 %1002 }
 0x611   : > { %2067 = vrcp.f32 %v1003_v39 }
 0x612   : > { %2069 = vrcp.f32 %v1114_v34 }
 0x614   : > { %v1008_v40 = vpop.permute.xlu1 %1007 }
 0x615   : > { %v1013_v41 = vsel %vm789_vm4, %v1008_v40, 0 }
 0x616   : > { %1832 = vmatpush3.bf16.msra.mxu0 %v1013_v41  ;;  %v1269_v41 = vrot.slane %v3056_v19, %v1268_v37 }
 0x617   : > { %1843 = vmatprep.subr.bf16.mxu0 %v2488_v11 }
 0x618   : > { %v1119_v44 = vpop.permute.xlu1 %1118 }
 0x619   : > { %v1124_v47 = vsel %vm789_vm4, %v1119_v44, 0 }
 0x61b   : > { %v2068_v42 = vpop.eup %2067 }
 0x61c   : > { %v1005_v43 = vmul.f32 %v2068_v42, %v2062_v24  ;;  %v2070_v46 = vpop.eup %2069 }
 0x61d   : > { %v1116_v48 = vmul.f32 %v2070_v46, %v2060_v18  ;;  %v1192_v18 = vrot.slane %v3056_v19, %v1191_v16  ;;  %v2050_v46 = vld [vmem:[%s3030_s16 + $0x8] sm:$0xff]  }
 0x61e   : > { %v1006_v45 = vpack.c.bf16 %v1005_v43, %v1005_v43 }
 0x61f   : > { %v1117_v49 = vpack.c.bf16 %v1116_v48, %v1116_v48  ;;  %v2052_v48 = vld [vmem:[%s3030_s16 + $0x18] sm:$0xff]  }
 0x620   : > { %1834 = vmatmul.mubr.msk.bf16.vlgmr.msra.gmra.mrb[12].mxu0 %vm725_vm3, %v1006_v45  ;;  %v2049_v45 = vld [vmem:[%s3030_s16] sm:$0xff]  }
 0x621   : > { %1844 = vmatpush3.bf16.msra.mxu0 %v1124_v47  ;;  %1845 = vmatprep.mubr.msk.bf16.mxu0 %vm2489_vm2, %v2488_v11  ;;  %v2051_v47 = vld [vmem:[%s3030_s16 + $0x10] sm:$0xff]  }
 0x622   : > { %1857 = vmatprep.subr.bf16.mxu0 %v2488_v11 }
 0x628   : > { %1846 = vmatmul.mubr.msk.bf16.vlgmr.msra.gmra.mrb[16].mxu0 %vm725_vm3, %v1117_v49  ;;  %v1745_v49 = vld [vmem:[%s540_s0] ss:$0 sm:$0xff] }
 0x629   : > { %1861 = vmatprep.mubr.msk.bf16.mxu0 %vm2489_vm2, %v2488_v11  ;;  %1858 = vmatpush3.bf16.msra.mxu0 %v2047_v32 }
 0x62a   : > { %1859 = vmatprep.subr.bf16.mxu0 %v2488_v11 }
 0x62d   : > { %1860 = vmatpush3.bf16.msra.mxu0 %v2048_v33 }
 0x6be   : > { %v827_v50 = vpop.f32.mrb[4].mxu0 }
 0x6bf   : > { %v1811_v51 = vpop.f32.mrb[5].mxu0  ;;  %v833_v9 = vpack.c.bf16 %v827_v50, %v827_v50 }
 0x6c0   : > { %v830_v52 = vpop.f32.mrb[6].mxu0 }
 0x6c1   : > { %v1812_v53 = vpop.f32.mrb[7].mxu0 }
 0x6cf   : > { %v938_v54 = vpop.f32.mrb[8].mxu0 }
 0x6d0   : > { %v944_v55 = vpack.c.bf16 %v938_v54, %v938_v54  ;;  %v1823_v56 = vpop.f32.mrb[9].mxu0 }
 0x6d1   : > { %v941_v57 = vpop.f32.mrb[10].mxu0 }
 0x6d2   : > { %1168 = vrot.lane.b32.xlu0 %v944_v55, %s2501_s23  ;;  %v1824_v58 = vpop.f32.mrb[11].mxu0 }
 0x6f3   : > { %v1049_v61 = vpop.f32.mrb[12].mxu0 }
 0x6f4   : > { %v1055_v62 = vpack.c.bf16 %v1049_v61, %v1049_v61  ;;  %v1835_v63 = vpop.f32.mrb[13].mxu0 }
 0x6f5   : > { %v1052_v0 = vpop.f32.mrb[14].mxu0 }
 0x6f6   : > { %1171 = vrot.lane.b32.xlu1 %v1055_v62, %s2502_s25  ;;  %v1836_v1 = vpop.f32.mrb[15].mxu0  ;;  %v1358_v0 = vsub.s32 5, %v3052_v17 }
 0x6f8   : > { %v1359_v1 = vrot.slane %v3056_v19, %v1358_v0 }
 0x6fb   : > { %v1160_v2 = vpop.f32.mrb[16].mxu0 }
 0x6fc   : > { %v1166_v4 = vpack.c.bf16 %v1160_v2, %v1160_v2  ;;  %v1847_v5 = vpop.f32.mrb[17].mxu0 }
 0x6fd   : > { %v1163_v6 = vpop.f32.mrb[18].mxu0 }
 0x6fe   : > { %1174 = vrot.lane.b32.xlu0 %v1166_v4, %s2503_s22  ;;  %v1848_v7 = vpop.f32.mrb[19].mxu0 }
 0x744   : > { %v1169_v8 = vpop.permute.xlu0 %1168 }
 0x745   : > { %v1178_v12 = vsel %vm725_vm3, %v833_v9, %v1169_v8 }
 0x768   : > { %v1172_v10 = vpop.permute.xlu1 %1171 }
 0x769   : > { %v1181_v13 = vsel %vm1179_vm5, %v1178_v12, %v1172_v10 }
 0x770   : > { %v1175_v14 = vpop.permute.xlu0 %1174 }
 0x771   : > { %v1184_v15 = vsel %vm1182_vm6, %v1181_v13, %v1175_v14 }
 0x772   : > { %1854 = vmatmul.mubr.msk.bf16.vlgmr.msra.gmra.mrb[16].mxu1 %vm629_vm1, %v1184_v15 }
 0x773   : > { %1873 = vmatprep.mubr.msk.bf16.mxu1 %vm2489_vm2, %v2488_v11  ;;  %1866 = vmatpush3.bf16.msra.mxu1 %v2049_v45 }
 0x774   : > { %1867 = vmatprep.subr.bf16.mxu1 %v2488_v11 }
 0x777   : > { %1868 = vmatpush3.bf16.msra.mxu1 %v2050_v46 }
 0x778   : > { %1869 = vmatprep.subr.bf16.mxu1 %v2488_v11 }
 0x77b   : > { %1870 = vmatpush3.bf16.msra.mxu1 %v2051_v47 }
 0x77c   : > { %1871 = vmatprep.subr.bf16.mxu1 %v2488_v11 }
 0x77f   : > { %1872 = vmatpush3.bf16.msra.mxu1 %v2052_v48 }
 0x845   : > { %v1241_v20 = vpop.f32.mrb[16].mxu1 }
 0x846   : > { %v1242_v21 = vadd.f32 %v1241_v20, %v1192_v18  ;;  %v1855_v22 = vpop.f32.mrb[17].mxu1 }
 0x847   : > { %v1244_v23 = vpop.f32.mrb[18].mxu1  ;;  %v1454_v22 = vsub.s32 (!%p1754_p5), 7, %v3052_v17 }
 0x848   : > { %v3141_v24 = vadd.f32 %v1242_v21, %v3034_v3  ;;  %v1856_v25 = vpop.f32.mrb[19].mxu1  ;;  %v1449_v21 = vsub.s32 (!%p1754_p5), 6, %v3052_v17 }
 0x849   : > { %v1455_v25 = vrot.slane (!%p1754_p5), %v3056_v19, %v1454_v22 }
 0x84a   : > { %v1248_v26 = vsel %vm629_vm1, %v3141_v24, 0.0  ;;  %v1450_v23 = vrot.slane (!%p1754_p5), %v3056_v19, %v1449_v21 }
 0x84b   : > { %1249 = vadd.xlane.f32.xlu1 %v1248_v26 }
 0x8d8   : > { %v1250_v27 = vpop.xlane.xlu1 %1249 }
 0x8d9   : > { %v1251_v28 = vmul.f32 0.03125, %v1250_v27 }
 0x8db   : > { %v1252_v29 = vsub.f32 %v3141_v24, %v1251_v28 }
 0x8dd   : > { %v1253_v30 = vmul.f32 %v1252_v29, %v1252_v29 }
 0x8df   : > { %v1254_v31 = vsel %vm629_vm1, %v1253_v30, 0.0 }
 0x8e0   : > { %1255 = vadd.xlane.f32.xlu0 %v1254_v31 }
 0x96d   : > { %v1256_v3 = vpop.xlane.xlu0 %1255 }
 0x96e   : > { %v1257_v34 = vmul.f32 0.03125, %v1256_v3 }
 0x970   : > { %v1258_v35 = vadd.f32 1e-06, %v1257_v34 }
 0x972   : > { %2071 = vrsqrt.f32 %v1258_v35 }
 0x97c   : > { %v2072_v39 = vpop.eup %2071 }
 0x97d   : > { %v1260_v40 = vmul.f32 %v2072_v39, %v1252_v29 }
 0x97f   : > { %v1265_v42 = vmul.f32 %v1264_v38, %v1260_v40 }
 0x981   : > { %v1270_v43 = vadd.f32 %v1269_v41, %v1265_v42 }
 0x983   : > { %v1271_v44 = vpack.c.bf16 %v1270_v43, %v1270_v43 }
 0x985   : > { %1862 = vmatmul.mubr.msk.bf16.vlgmr.msra.gmra.mrb[20].mxu0 %vm629_vm1, %v1271_v44 }
 0xa58   : > { %v1332_v50 = vpop.f32.mrb[20].mxu0 }
 0xa59   : > { %v1333_v51 = vadd.f32 %v1745_v49, %v1332_v50  ;;  %v1863_v52 = vpop.f32.mrb[21].mxu0 }
 0xa5a   : > { %v1335_v53 = vpop.f32.mrb[22].mxu0 }
 0xa5b   : > { %v1339_v54 = vmul.f32 0.044715, %v1333_v51  ;;  %v1864_v55 = vpop.f32.mrb[23].mxu0  ;;  %v1338_v61 = vmul.f32 0.5, %v1333_v51 }
 0xa5d   : > { %v1340_v56 = vmul.f32 %v1339_v54, %v1333_v51 }
 0xa5f   : > { %v1341_v57 = vmul.f32 %v1340_v56, %v1333_v51 }
 0xa61   : > { %v1342_v58 = vadd.f32 %v1341_v57, %v1333_v51 }
 0xa63   : > { %v1343_v59 = vmul.f32 0.7978846, %v1342_v58 }
 0xa65   : > { %2073 = vtanh.f32 %v1343_v59 }
 0xa6f   : > { %v2074_v60 = vpop.eup %2073 }
 0xa70   : > { %v1345_v62 = vadd.f32 1.0, %v2074_v60 }
 0xa72   : > { %v1346_v63 = vmul.f32 %v1345_v62, %v1338_v61 }
 0xa74   : > { %v1347_v11 = vpack.c.bf16 %v1346_v63, %v1346_v63 }
 0xa76   : > { %1874 = vmatmul.mubr.msk.bf16.vlgmr.msra.gmra.mrb[20].mxu1 %vm1384_vm7, %v1347_v11 }
 0xb48   : > { %1433 = sbr.rel (%p1754_p5) target bundleno = 3208 (0xc88), region = 100 }
 0xb49   : > { %v1422_v2 = vpop.f32.mrb[20].mxu1 }
 0xb4a   : > { %v1423_v4 = vadd.f32 %v1422_v2, %v1359_v1  ;;  %v1875_v5 = vpop.f32.mrb[21].mxu1 }
 0xb4b   : > { %v1425_v6 = vpop.f32.mrb[22].mxu1 }
 0xb4c   : > { %v1428_v7 = vadd.f32 %v1423_v4, %v3141_v24  ;;  %v1876_v8 = vpop.f32.mrb[23].mxu1 }
 0xb4e   : > { %1429 = vst.msk [vmem:[#allocation2] sm:$0xff] %vm629_vm1, %v1428_v7  ;;  %v1434_v9 = vsel (!%p1754_p5), %vm629_vm1, %v1428_v7, 0.0 }
 0xb4f   : > { %1435 = vadd.xlane.f32.xlu0 %v1434_v9 }
 0xbdc   : > { %v1436_v10 = vpop.xlane.xlu0 %1435 }
 0xbdd   : > { %v1437_v12 = vmul.f32 0.03125, %v1436_v10 }
 0xbdf   : > { %v1438_v13 = vsub.f32 %v1428_v7, %v1437_v12 }
 0xbe1   : > { %v1439_v14 = vmul.f32 %v1438_v13, %v1438_v13 }
 0xbe3   : > { %v1440_v15 = vsel %vm629_vm1, %v1439_v14, 0.0 }
 0xbe4   : > { %1441 = vadd.xlane.f32.xlu0 %v1440_v15 }
 0xc71   : > { %v1442_v16 = vpop.xlane.xlu0 %1441 }
 0xc72   : > { %v1443_v18 = vmul.f32 0.03125, %v1442_v16 }
 0xc74   : > { %v1444_v20 = vadd.f32 1e-06, %v1443_v18 }
 0xc76   : > { %2075 = vrsqrt.f32 %v1444_v20 }
 0xc80   : > { %v2076_v24 = vpop.eup %2075 }
 0xc81   : > { %v1446_v26 = vmul.f32 %v2076_v24, %v1438_v13 }
 0xc83   : > { %v1451_v27 = vmul.f32 %v1450_v23, %v1446_v26 }
 0xc85   : > { %v1456_v28 = vadd.f32 %v1455_v25, %v1451_v27 }
 0xc87   : > { %1457 = vst.msk [vmem:[%s616_s8] sm:$0xff] %vm629_vm1, %v1456_v28 }
 0xc88 PF: > { %s3321_s29 = sld [smem:[#allocation23_spill]]  ;;  %s3322_s16 = sld [smem:[#allocation35_spill]] }
 0xc89   : > { %s1472_s14 = sshll.u32 %s616_s8, 4  ;;  %s1459_s27 = scalar_lea.sflag [#allocation5], %s482_s2  ;;  %s1473_s14 = int_to_ptr.vmem [resolvable:$true] %s1472_s14 }
 0xc8a   : > { %s2345_s15 = scalar_lea.vmem %s1473_s14, 128  ;;  %p3324_p12 = scmp.ne.s32.totalorder %s3305_s11, 0 }
 0xc8b   : > { %p2346_p11 = scmp.ne.s32.totalorder %s1473_s14, %s2345_s15  ;;  %s2504_s4 = smov [#allocation15]  }
 0xc8c   : > { %s2349_s9 = sshll.u32 %s2504_s4, 4  ;;  %s2350_s9 = int_to_ptr.vmem [resolvable:$false] %s2349_s9 }
 0xc8d   : > { %p2347_p4 = pnand %p2346_p11, %p3324_p12  ;;  %s2351_s23 = scalar_lea.vmem %s2350_s9, 256 }
 0xc8e   : > { %s1756_s28 = sshll.u32 %s3321_s29, 7  ;;  %s3323_s26 = smov %s3322_s16 }
 0xc8f   : > { %s3184_s18 = scalar_lea.hbm %s3322_s16, %s1756_s28  ;;  %p2348_p6 = pneg %p2347_p4 }
 0xc90   : > { %p2352_p13 = scmp.lt.s32.totalorder %s1473_s14, %s2350_s9  ;;  %p2353_p9 = scmp.lt.s32.totalorder %s2351_s23, %s2345_s15 }
 0xc92   : > { %p2354_p1 = por %p2353_p9, %p2352_p13 }
 0xc94   : > { %p2355_p10 = pnand %p2354_p1, %p2348_p6 }
 0xc96   : > { %2358 = shalt.err (!%p2355_p10)
}
 0xc97   : > { %s2359_s2 = scalar_lea.hbm %s3184_s18, 128  ;;  %s2363_s25 = scalar_lea.hbm %s3323_s26, 256 }
 0xc98   : > { %p2360_p7 = scmp.ne.s32.totalorder %s3184_s18, %s2359_s2  ;;  %p2364_p0 = scmp.lt.u32.totalorder %s3184_s18, %s3323_s26 }
 0xc99   : > { %p2365_p8 = scmp.lt.u32.totalorder %s2363_s25, %s2359_s2  ;;  %p2367_p11 = scmp.lt.u32.totalorder %s2359_s2, %s3184_s18 }
 0xc9a   : > { %p2361_p3 = pnand %p2360_p7, %p3324_p12 }
 0xc9b   : > { %p2366_p5 = por %p2365_p8, %p2364_p0 }
 0xc9c   : > { %p2362_p2 = pneg %p2361_p3 }
 0xc9d   : > { %p2368_p4 = por %p2367_p11, %p2366_p5 }
 0xc9f   : > { %p2369_p6 = pnand %p2368_p4, %p2362_p2 }
 0xca1   : > { %2372 = shalt.err (!%p2369_p6)
}
 0xca2   : > { %1897 = dma.vmem_to_hbm [thread:$0]  (%p3324_p12), %s1473_s14, 128, %s3184_s18, %s1459_s27  }
 0xca3 PF: > { %p1935_p13 = scmp.ge.s32.totalorder %s2475_s19, 2  ;;  %s1484_s29 = sand.u32 1, %s2447_s12  }
 0xca4   : > { %p3325_p9 = scmp.ne.s32.totalorder %s3306_s30, 0  ;;  %s1485_s28 = scalar_lea.sflag [#allocation5], %s1484_s29 }
 0xca6   : > { %p1929_p1 = pnand %p1935_p13, %p3325_p9 }
 0xca8   : > { %2430 = dma.done.wait (!%p1929_p1), %s1485_s28, 128  }
 0xca9   : > { %2432 = vsyncadd (!%p1929_p1), %s1485_s28, 4294967168  ;;  %s26_s19 = sadd.s32 1, %s2475_s19   ;;  %s3326_s1 = sld [smem:[#allocation20_spill]] }
 0xcaa   : > { %p23_p10 = scmp.ge.s32.totalorder %s26_s19, 6   ;;  %s3327_s11 = sld [smem:[#allocation27_spill]] }
 0xcab   : > { %s3328_s0 = sld [smem:[#allocation21_spill]]  ;;  %s3329_s14 = sld [smem:[#allocation28_spill]] }
 0xcac   : > { %s3330_s16 = sld [smem:[#allocation24_spill]]  ;;  %s3331_s18 = sld [smem:[#allocation25_spill]] }
 0xcad   : > { %s3332_s27 = sld [smem:[#allocation26_spill]]  ;;  %s3333_s30 = smov %s2439_s10 }
 0xcae   : > { %s3335_s12 = smov %s2451_s13  ;;  %s3337_s15 = smov %s2467_s17 }
 0xcaf   : > { %s3334_s10 = smov %s3326_s1  ;;  %25 = sbr.rel (!%p23_p10) target bundleno = 18 (0x12), region = 190 }
 0xcb1   : > { %s3336_s13 = smov %s3328_s0 }
 0xcb2   : > { %s3338_s17 = smov %s3331_s18 }
 0xcb3   : > { %s3339_s18 = smov %s3332_s27 }
 0xcb6   :  { %1490 = vsyncpa [#allocation4], 1 }
 0xcb7   :  { %1492 = vsyncpa [#allocation4 + $0x1], 1 }
 0xcb8   :  { %1493 = vsyncpa [#allocation7], 1 }
 0xcb9   :  { %1494 = vsyncpa [#allocation5], 1 }
 0xcba   :  { %1496 = vsyncpa [#allocation5 + $0x1], 1 }

</bundles_post_ra>
